<compile_context>
chip_gen: v6e
topology: v6e:2x2x1
jax: 0.10.0
libtpu: 0.0.40
codegen_flags: <defaults>
</compile_context>

<pallas_src>
import jax
import jax.numpy as jnp
import numpy as np
from jax.experimental import pallas as pl
from jax.experimental.pallas import tpu as pltpu

BN_EPS = 1e-5  # F.batch_norm default eps


def hhn_mlp_kernel(hx_ref, hw1_ref, hb1_ref, hw2_ref, hb2_ref,
                   e_nu_ref, f_nu_ref, e_nc_ref, f_nc_ref,
                   x_ref, w1_ref, wh_ref, w2_ref,
                   out_ref, acc_ref):
    """Grid axis 0 = K-chunks of fc1's in_feat contraction (reduction, 'arbitrary').

    hx_ref   : (1, hin)  f32                hyper-net input
    hw1_ref  : (hin, 64) f32, hb1_ref (1, 64)        hyper Linear 1 (pre-transposed)
    hw2_ref  : (64, dims) f32, hb2_ref (1, dims)     hyper Linear 2 (pre-transposed)
    e_nu_ref : (dims, DN_PAD) f32           expansion matrix (hyper -> per-lane scale)
    f_nu_ref : (DN_PAD, NU_PAD) f32         0/1 fold matrix (sum per-dim lane groups)
    e_nc_ref : (dims, DC_PAD) f32
    f_nc_ref : (DC_PAD, NC_PAD) f32
    x_ref    : (B, tk)   bf16               K-chunk of the flattened image batch
    w1_ref   : (tk, DN_PAD) bf16            K-chunk of dims-packed fc1 weight
    wh_ref   : (L-1, NU_PAD, DN_PAD) bf16   dims-packed hidden weight stacks (resident)
    w2_ref   : (NU_PAD, DC_PAD) bf16        dims-packed fc2 weight (resident)
    out_ref  : (B, NC_PAD) f32
    acc_ref  : (B, DN_PAD) f32 scratch      raw (uncombined) fc1 partial accumulator
    """
    f32 = jnp.float32
    bf16 = jnp.bfloat16
    k = pl.program_id(0)
    nk = pl.num_programs(0)
    n_hidden = wh_ref.shape[0]

    # ---- fc1 K-chunk: one packed MXU dot (B, tk) @ (tk, dims*NU) -----------
    part = jnp.dot(x_ref[...], w1_ref[...], preferred_element_type=f32)

    @pl.when(k == 0)
    def _():
        acc_ref[...] = part

    @pl.when(k > 0)
    def _():
        acc_ref[...] = acc_ref[...] + part

    # ---- last step: hyper net, combine, hidden layers + BN, fc2 ------------
    @pl.when(k == nk - 1)
    def _():
        # Tiny hyper network (f32): Linear -> ReLU -> Linear -> Softmax.
        h = jnp.maximum(
            jnp.dot(hx_ref[...], hw1_ref[...], preferred_element_type=f32)
            + hb1_ref[...], 0.0)
        ho = jnp.dot(h, hw2_ref[...], preferred_element_type=f32) + hb2_ref[...]
        ho = ho - jnp.max(ho, axis=-1, keepdims=True)
        e = jnp.exp(ho)
        hyper = e / jnp.sum(e, axis=-1, keepdims=True)                 # (1, dims)

        # Per-lane hyper scales: scale[0, d*n + j] = hyper[d].
        scale_nu = jnp.dot(hyper, e_nu_ref[...], preferred_element_type=f32)
        scale_nc = jnp.dot(hyper, e_nc_ref[...], preferred_element_type=f32)

        # fc1 combine (scale per-dim lane groups, fold with F) + ReLU.
        logits = jnp.maximum(
            jnp.dot(acc_ref[...] * scale_nu, f_nu_ref[...],
                    preferred_element_type=f32), 0.0)                  # (B, NU_PAD)

        # Hidden layers: Linear -> BN(train, no affine) -> ReLU.
        for l in range(n_hidden):
            ph = jnp.dot(logits.astype(bf16), wh_ref[l],
                         preferred_element_type=f32)                   # (B, DN_PAD)
            z = jnp.dot(ph * scale_nu, f_nu_ref[...],
                        preferred_element_type=f32)                    # (B, NU_PAD)
            mean = jnp.mean(z, axis=0, keepdims=True)                  # full-batch stats
            var = jnp.mean((z - mean) ** 2, axis=0, keepdims=True)     # biased (torch BN)
            logits = jnp.maximum((z - mean) * jax.lax.rsqrt(var + BN_EPS), 0.0)

        # fc2.
        po = jnp.dot(logits.astype(bf16), w2_ref[...],
                     preferred_element_type=f32)                       # (B, DC_PAD)
        out_ref[...] = jnp.dot(po * scale_nc, f_nc_ref[...],
                               preferred_element_type=f32)             # (B, NC_PAD)


def _round_up(x, m):
    return ((x + m - 1) // m) * m


def pack_kernel_params(params):
    """Pack the dims axis into lanes; zero-pad to 128 lanes; bf16 MXU operands."""
    w1_t, wh_t, w2_t = params["w1_t"], params["wh_t"], params["w2_t"]
    dims, in_feat, nu = w1_t.shape
    n_hidden = wh_t.shape[0]
    nc = w2_t.shape[-1]
    bf16, f32 = jnp.bfloat16, jnp.float32

    nu_pad = max(_round_up(nu, 128), 128)
    nc_pad = max(_round_up(nc, 128), 128)
    dn, dc = dims * nu, dims * nc
    dn_pad = max(_round_up(dn, 128), 128)
    dc_pad = max(_round_up(dc, 128), 128)

    # dims packed into lanes: *_p[i, d*n + j] = *_t[d, i, j].
    w1_p = jnp.zeros((in_feat, dn_pad), bf16).at[:, :dn].set(
        jnp.transpose(w1_t, (1, 0, 2)).reshape(in_feat, dn).astype(bf16))
    wh_p = jnp.zeros((n_hidden, nu_pad, dn_pad), bf16).at[:, :nu, :dn].set(
        jnp.transpose(wh_t, (0, 2, 1, 3)).reshape(n_hidden, nu, dn).astype(bf16))
    w2_p = jnp.zeros((nu_pad, dc_pad), bf16).at[:nu, :dc].set(
        jnp.transpose(w2_t, (1, 0, 2)).reshape(nu, dc).astype(bf16))

    # Static expansion (E) and fold (F) matrices for the hyper-softmax combine.
    def make_e_f(n, d_pad, n_pad):
        col = jnp.arange(d_pad)
        e = ((col[None, :] // n == jnp.arange(dims)[:, None])
             & (col[None, :] < dims * n))
        row = jnp.arange(d_pad)[:, None]
        cj = jnp.arange(n_pad)[None, :]
        f = (row % n == cj) & (row < dims * n) & (cj < n)
        return e.astype(f32), f.astype(f32)

    e_nu, f_nu = make_e_f(nu, dn_pad, nu_pad)
    e_nc, f_nc = make_e_f(nc, dc_pad, nc_pad)

    return dict(hw1_t=params["hw1_t"].astype(f32), hb1=params["hb1"].astype(f32),
                hw2_t=params["hw2_t"].astype(f32), hb2=params["hb2"].astype(f32),
                w1_p=w1_p, wh_p=wh_p, w2_p=w2_p,
                e_nu=e_nu, f_nu=f_nu, e_nc=e_nc, f_nc=f_nc,
                nu_pad=nu_pad, nc_pad=nc_pad, dn_pad=dn_pad, dc_pad=dc_pad,
                n_classes=nc, dims=dims)


def hhn_mlp_forward(x, hyper_x, kp):
    B = x.shape[0]
    x_flat = x.reshape(B, -1).astype(jnp.bfloat16)   # == torch.flatten(x, 1), bf16 MXU operand
    hx = hyper_x.reshape(1, -1).astype(jnp.float32)

    in_feat, dn_pad = kp["w1_p"].shape
    n_hidden = kp["wh_p"].shape[0]
    nu_pad, dc_pad = kp["w2_p"].shape
    nc_pad = kp["nc_pad"]
    hin = hx.shape[1]

    # K tiling of fc1's contraction: one step if the double-buffered streamed
    # chunks fit a conservative budget (v5e-safe); else largest fitting
    # 128-multiple divisor of in_feat.
    budget = 6 << 20

    def chunk_bytes(t):
        return 2 * (B * t * 2) + 2 * (t * dn_pad * 2)

    tk = in_feat
    if chunk_bytes(in_feat) > budget:
        tk = 128
        c = 128
        while c < in_feat:
            if in_feat % c == 0 and chunk_bytes(c) <= budget:
                tk = c
            c += 128
    nk = in_feat // tk

    def nbytes(a):
        return a.size * a.dtype.itemsize

    resident = (chunk_bytes(tk)
                + 2 * (nbytes(kp["wh_p"]) + nbytes(kp["w2_p"]))
                + 2 * (nbytes(kp["e_nu"]) + nbytes(kp["f_nu"])
                       + nbytes(kp["e_nc"]) + nbytes(kp["f_nc"]))
                + 2 * (nbytes(hx) + nbytes(kp["hw1_t"]) + nbytes(kp["hb1"])
                       + nbytes(kp["hw2_t"]) + nbytes(kp["hb2"]))
                + 2 * (B * nc_pad * 4)
                + B * dn_pad * 4)
    vmem_limit = min(int(resident * 1.5) + (4 << 20), 96 << 20)

    flops = int(2 * B * in_feat * dn_pad
                + 2 * B * dn_pad * nu_pad
                + n_hidden * (2 * B * nu_pad * dn_pad + 2 * B * dn_pad * nu_pad)
                + 2 * B * nu_pad * dc_pad + 2 * B * dc_pad * nc_pad
                + 2 * (hin * 64 + 64 * kp["dims"]))
    bytes_accessed = int(nbytes(x_flat) + nbytes(kp["w1_p"]) + nbytes(kp["wh_p"])
                         + nbytes(kp["w2_p"]) + nbytes(kp["e_nu"]) + nbytes(kp["f_nu"])
                         + nbytes(kp["e_nc"]) + nbytes(kp["f_nc"])
                         + nbytes(hx) + nbytes(kp["hw1_t"]) + nbytes(kp["hb1"])
                         + nbytes(kp["hw2_t"]) + nbytes(kp["hb2"]) + B * nc_pad * 4)

    grid_spec = pltpu.PrefetchScalarGridSpec(
        num_scalar_prefetch=0,
        grid=(nk,),
        in_specs=[
            pl.BlockSpec(hx.shape, lambda k: (0, 0)),
            pl.BlockSpec(kp["hw1_t"].shape, lambda k: (0, 0)),
            pl.BlockSpec(kp["hb1"].shape, lambda k: (0, 0)),
            pl.BlockSpec(kp["hw2_t"].shape, lambda k: (0, 0)),
            pl.BlockSpec(kp["hb2"].shape, lambda k: (0, 0)),
            pl.BlockSpec(kp["e_nu"].shape, lambda k: (0, 0)),
            pl.BlockSpec(kp["f_nu"].shape, lambda k: (0, 0)),
            pl.BlockSpec(kp["e_nc"].shape, lambda k: (0, 0)),
            pl.BlockSpec(kp["f_nc"].shape, lambda k: (0, 0)),
            pl.BlockSpec((B, tk), lambda k: (0, k)),            # x K-chunk
            pl.BlockSpec((tk, dn_pad), lambda k: (k, 0)),       # packed w1 K-chunk
            pl.BlockSpec(kp["wh_p"].shape, lambda k: (0, 0, 0)),  # resident
            pl.BlockSpec(kp["w2_p"].shape, lambda k: (0, 0)),     # resident
        ],
        out_specs=pl.BlockSpec((B, nc_pad), lambda k: (0, 0)),
        scratch_shapes=[
            pltpu.VMEM((B, dn_pad), jnp.float32),   # raw fc1 partial accumulator
        ],
    )

    out_padded = pl.pallas_call(
        hhn_mlp_kernel,
        out_shape=jax.ShapeDtypeStruct((B, nc_pad), jnp.float32),
        grid_spec=grid_spec,
        compiler_params=pltpu.CompilerParams(
            dimension_semantics=("arbitrary",),       # K is a reduction axis
            vmem_limit_bytes=vmem_limit),
        cost_estimate=pl.CostEstimate(flops=flops, transcendentals=int(kp["dims"]),
                                      bytes_accessed=bytes_accessed),
    )(hx, kp["hw1_t"], kp["hb1"], kp["hw2_t"], kp["hb2"],
      kp["e_nu"], kp["f_nu"], kp["e_nc"], kp["f_nc"],
      x_flat, kp["w1_p"], kp["wh_p"], kp["w2_p"])

    return out_padded[:, :kp["n_classes"]]


def init_params(key, hin, dimensions, n_layers, n_units, n_channels, n_classes):
    """Deterministic kaiming_uniform(a=sqrt(5))-style init: U(-1/sqrt(fan_in), 1/sqrt(fan_in))."""
    in_feat = 32 * 32 * n_channels
    ks = jax.random.split(key, 7)

    def u(k, shape, fan_in):
        b = 1.0 / float(fan_in) ** 0.5
        return jax.random.uniform(k, shape, jnp.float32, -b, b)

    hw1 = u(ks[0], (64, hin), hin)                                   # torch (out, in)
    hb1 = u(ks[1], (1, 64), hin)
    hw2 = u(ks[2], (dimensions, 64), 64)
    hb2 = u(ks[3], (1, dimensions), 64)
    w1 = u(ks[4], (dimensions, n_units, in_feat), in_feat)
    wh = u(ks[5], (n_layers - 1, dimensions, n_units, n_units), n_units)
    w2 = u(ks[6], (dimensions, n_classes, n_units), n_units)

    return dict(
        hw1_t=hw1.T, hb1=hb1, hw2_t=hw2.T, hb2=hb2,
        w1_t=jnp.transpose(w1, (0, 2, 1)),        # (dims, in_feat, n_units)
        wh_t=jnp.transpose(wh, (0, 1, 3, 2)),     # (L-1, dims, n_units, n_units)
        w2_t=jnp.transpose(w2, (0, 2, 1)),        # (dims, n_units, n_classes)
    )


def reference_forward(x, hyper_x, p):
    """Pure-JAX f32 reference mirroring the PyTorch forward."""
    hx = hyper_x.reshape(1, -1)
    h = jnp.maximum(hx @ p["hw1_t"] + p["hb1"], 0.0)
    hyper = jax.nn.softmax(h @ p["hw2_t"] + p["hb2"], axis=-1)[0]
    w1 = jnp.einsum("d,dio->io", hyper, p["w1_t"])
    w2 = jnp.einsum("d,dio->io", hyper, p["w2_t"])
    logits = jnp.maximum(x.reshape(x.shape[0], -1) @ w1, 0.0)
    for l in range(p["wh_t"].shape[0]):
        wl = jnp.einsum("d,dio->io", hyper, p["wh_t"][l])
        logits = logits @ wl
        mean = logits.mean(0, keepdims=True)
        var = ((logits - mean) ** 2).mean(0, keepdims=True)
        logits = jnp.maximum((logits - mean) / jnp.sqrt(var + BN_EPS), 0.0)
    return logits @ w2


if __name__ == "__main__":
    # Small, forward-consistent shapes (fc1 input is hard-coded to 32*32*C in the module).
    hin, dimensions, n_layers, n_units, n_channels, n_classes = 8, 4, 3, 32, 3, 10
    B = 8

    key = jax.random.PRNGKey(0)
    kp_key, kx, kh = jax.random.split(key, 3)
    params = init_params(kp_key, hin, dimensions, n_layers, n_units, n_channels, n_classes)
    kparams = pack_kernel_params(params)

    x = jax.random.normal(kx, (B, n_channels, 32, 32), jnp.float32)
    hyper_x = jax.random.normal(kh, (hin,), jnp.float32)

    out = hhn_mlp_forward(x, hyper_x, kparams)
    out = jax.block_until_ready(out)

    ref = reference_forward(x, hyper_x, params)
    assert out.shape == (B, n_classes)
    np.testing.assert_allclose(np.asarray(out), np.asarray(ref), atol=5e-2, rtol=5e-2)

    print("KERNEL_OK")
</pallas_src>

<mosaic_0001>
module attributes {stable_mosaic.version = 11 : i64} {
  func.func @hhn_mlp_kernel(%arg0: i32, %arg1: memref<1x8xf32, #tpu.memory_space<vmem>>, %arg2: memref<8x64xf32, #tpu.memory_space<vmem>>, %arg3: memref<1x64xf32, #tpu.memory_space<vmem>>, %arg4: memref<64x4xf32, #tpu.memory_space<vmem>>, %arg5: memref<1x4xf32, #tpu.memory_space<vmem>>, %arg6: memref<4x128xf32, #tpu.memory_space<vmem>>, %arg7: memref<128x128xf32, #tpu.memory_space<vmem>>, %arg8: memref<4x128xf32, #tpu.memory_space<vmem>>, %arg9: memref<128x128xf32, #tpu.memory_space<vmem>>, %arg10: memref<8x3072xbf16, #tpu.memory_space<vmem>>, %arg11: memref<3072x128xbf16, #tpu.memory_space<vmem>>, %arg12: memref<2x128x128xbf16, #tpu.memory_space<vmem>>, %arg13: memref<128x128xbf16, #tpu.memory_space<vmem>>, %arg14: memref<8x128xf32, #tpu.memory_space<vmem>>, %arg15: memref<8x128xf32, #tpu.memory_space<vmem>>) attributes {dimension_semantics = [#tpu.dimension_semantics<arbitrary>], iteration_bounds = array<i64: 1>, scalar_prefetch = 0 : i64, scratch_operands = 1 : i64, tpu.core_type = #tpu.core_type<tc>, window_params = [{pipeline_mode = #tpu.pipeline_mode<synchronous>, transform_indices = @transform_0, window_bounds = array<i64: 1, 8>}, {pipeline_mode = #tpu.pipeline_mode<synchronous>, transform_indices = @transform_1, window_bounds = array<i64: 8, 64>}, {pipeline_mode = #tpu.pipeline_mode<synchronous>, transform_indices = @transform_2, window_bounds = array<i64: 1, 64>}, {pipeline_mode = #tpu.pipeline_mode<synchronous>, transform_indices = @transform_3, window_bounds = array<i64: 64, 4>}, {pipeline_mode = #tpu.pipeline_mode<synchronous>, transform_indices = @transform_4, window_bounds = array<i64: 1, 4>}, {pipeline_mode = #tpu.pipeline_mode<synchronous>, transform_indices = @transform_5, window_bounds = array<i64: 4, 128>}, {pipeline_mode = #tpu.pipeline_mode<synchronous>, transform_indices = @transform_6, window_bounds = array<i64: 128, 128>}, {pipeline_mode = #tpu.pipeline_mode<synchronous>, transform_indices = @transform_7, window_bounds = array<i64: 4, 128>}, {pipeline_mode = #tpu.pipeline_mode<synchronous>, transform_indices = @transform_8, window_bounds = array<i64: 128, 128>}, {transform_indices = @transform_9, window_bounds = array<i64: 8, 3072>}, {transform_indices = @transform_10, window_bounds = array<i64: 3072, 128>}, {pipeline_mode = #tpu.pipeline_mode<synchronous>, transform_indices = @transform_11, window_bounds = array<i64: 2, 128, 128>}, {pipeline_mode = #tpu.pipeline_mode<synchronous>, transform_indices = @transform_12, window_bounds = array<i64: 128, 128>}, {pipeline_mode = #tpu.pipeline_mode<synchronous>, transform_indices = @transform_13, window_bounds = array<i64: 8, 128>}]} {
    %c0 = arith.constant 0 : index
    %c0_0 = arith.constant 0 : index
    %0 = vector.load %arg10[%c0, %c0_0] : memref<8x3072xbf16, #tpu.memory_space<vmem>>, vector<8x3072xbf16>
    %c0_1 = arith.constant 0 : index
    %c0_2 = arith.constant 0 : index
    %1 = vector.load %arg11[%c0_1, %c0_2] : memref<3072x128xbf16, #tpu.memory_space<vmem>>, vector<3072x128xbf16>
    %cst = arith.constant dense<0.000000e+00> : vector<8x128xf32>
    %2 = tpu.matmul %0, %1, %cst {dimension_numbers = #tpu.dot_dimension_numbers<[1], [0], [0], [1], [0, 0, 1, 1], [], []>} : vector<8x3072xbf16>, vector<3072x128xbf16>, vector<8x128xf32> -> vector<8x128xf32>
    %c0_i32 = arith.constant 0 : i32
    %3 = arith.cmpi eq, %arg0, %c0_i32 : i32
    %4 = arith.extui %3 : i1 to i32
    %c0_i32_3 = arith.constant 0 : i32
    %5 = arith.cmpi ne, %4, %c0_i32_3 : i32
    scf.if %5 {
      %c0_8 = arith.constant 0 : index
      %c0_9 = arith.constant 0 : index
      %12 = vector.load %arg15[%c0_8, %c0_9] : memref<8x128xf32, #tpu.memory_space<vmem>>, vector<8x128xf32>
      tpu.vector_store %arg15[%c0_8, %c0_9], %2 {strides = array<i32>} : memref<8x128xf32, #tpu.memory_space<vmem>>, vector<8x128xf32>,
    } else {
    }
    %c0_i32_4 = arith.constant 0 : i32
    %6 = arith.cmpi sgt, %arg0, %c0_i32_4 : i32
    %7 = arith.extui %6 : i1 to i32
    %c0_i32_5 = arith.constant 0 : i32
    %8 = arith.cmpi ne, %7, %c0_i32_5 : i32
    scf.if %8 {
      %c0_8 = arith.constant 0 : index
      %c0_9 = arith.constant 0 : index
      %12 = vector.load %arg15[%c0_8, %c0_9] : memref<8x128xf32, #tpu.memory_space<vmem>>, vector<8x128xf32>
      %13 = arith.addf %12, %2 : vector<8x128xf32>
      %c0_10 = arith.constant 0 : index
      %c0_11 = arith.constant 0 : index
      %14 = vector.load %arg15[%c0_10, %c0_11] : memref<8x128xf32, #tpu.memory_space<vmem>>, vector<8x128xf32>
      tpu.vector_store %arg15[%c0_10, %c0_11], %13 {strides = array<i32>} : memref<8x128xf32, #tpu.memory_space<vmem>>, vector<8x128xf32>,
    } else {
    }
    %c0_i32_6 = arith.constant 0 : i32
    %9 = arith.cmpi eq, %arg0, %c0_i32_6 : i32
    %10 = arith.extui %9 : i1 to i32
    %c0_i32_7 = arith.constant 0 : i32
    %11 = arith.cmpi ne, %10, %c0_i32_7 : i32
    scf.if %11 {
      %c0_8 = arith.constant 0 : index
      %c0_9 = arith.constant 0 : index
      %12 = vector.load %arg1[%c0_8, %c0_9] : memref<1x8xf32, #tpu.memory_space<vmem>>, vector<1x8xf32>
      %c0_10 = arith.constant 0 : index
      %c0_11 = arith.constant 0 : index
      %13 = vector.load %arg2[%c0_10, %c0_11] : memref<8x64xf32, #tpu.memory_space<vmem>>, vector<8x64xf32>
      %cst_12 = arith.constant dense<0.000000e+00> : vector<1x64xf32>
      %14 = tpu.matmul %12, %13, %cst_12 {dimension_numbers = #tpu.dot_dimension_numbers<[1], [0], [0], [1], [0, 0, 1, 1], [], []>} : vector<1x8xf32>, vector<8x64xf32>, vector<1x64xf32> -> vector<1x64xf32>
      %c0_13 = arith.constant 0 : index
      %c0_14 = arith.constant 0 : index
      %15 = vector.load %arg3[%c0_13, %c0_14] : memref<1x64xf32, #tpu.memory_space<vmem>>, vector<1x64xf32>
      %16 = arith.addf %14, %15 : vector<1x64xf32>
      %cst_15 = arith.constant 0.000000e+00 : f32
      %17 = vector.broadcast %cst_15 : f32 to vector<1x64xf32>
      %18 = arith.maximumf %16, %17 : vector<1x64xf32>
      %c0_16 = arith.constant 0 : index
      %c0_17 = arith.constant 0 : index
      %19 = vector.load %arg4[%c0_16, %c0_17] : memref<64x4xf32, #tpu.memory_space<vmem>>, vector<64x4xf32>
      %cst_18 = arith.constant dense<0.000000e+00> : vector<1x4xf32>
      %20 = tpu.matmul %18, %19, %cst_18 {dimension_numbers = #tpu.dot_dimension_numbers<[1], [0], [0], [1], [0, 0, 1, 1], [], []>} : vector<1x64xf32>, vector<64x4xf32>, vector<1x4xf32> -> vector<1x4xf32>
      %c0_19 = arith.constant 0 : index
      %c0_20 = arith.constant 0 : index
      %21 = vector.load %arg5[%c0_19, %c0_20] : memref<1x4xf32, #tpu.memory_space<vmem>>, vector<1x4xf32>
      %22 = arith.addf %20, %21 : vector<1x4xf32>
      %cst_21 = arith.constant dense<0xFF800000> : vector<1xf32>
      %23 = vector.multi_reduction <maximumf>, %22, %cst_21 [1] : vector<1x4xf32> to vector<1xf32>
      %24 = vector.shape_cast %23 : vector<1xf32> to vector<1x1xf32>
      %25 = vector.broadcast %24 : vector<1x1xf32> to vector<1x4xf32>
      %26 = arith.subf %22, %25 : vector<1x4xf32>
      %27 = math.exp %26 : vector<1x4xf32>
      %cst_22 = arith.constant dense<0.000000e+00> : vector<1xf32>
      %28 = vector.multi_reduction <add>, %27, %cst_22 [1] : vector<1x4xf32> to vector<1xf32>
      %29 = vector.shape_cast %28 : vector<1xf32> to vector<1x1xf32>
      %30 = vector.broadcast %29 : vector<1x1xf32> to vector<1x4xf32>
      %31 = arith.divf %27, %30 : vector<1x4xf32>
      %c0_23 = arith.constant 0 : index
      %c0_24 = arith.constant 0 : index
      %32 = vector.load %arg6[%c0_23, %c0_24] : memref<4x128xf32, #tpu.memory_space<vmem>>, vector<4x128xf32>
      %cst_25 = arith.constant dense<0.000000e+00> : vector<1x128xf32>
      %33 = tpu.matmul %31, %32, %cst_25 {dimension_numbers = #tpu.dot_dimension_numbers<[1], [0], [0], [1], [0, 0, 1, 1], [], []>} : vector<1x4xf32>, vector<4x128xf32>, vector<1x128xf32> -> vector<1x128xf32>
      %c0_26 = arith.constant 0 : index
      %c0_27 = arith.constant 0 : index
      %34 = vector.load %arg8[%c0_26, %c0_27] : memref<4x128xf32, #tpu.memory_space<vmem>>, vector<4x128xf32>
      %cst_28 = arith.constant dense<0.000000e+00> : vector<1x128xf32>
      %35 = tpu.matmul %31, %34, %cst_28 {dimension_numbers = #tpu.dot_dimension_numbers<[1], [0], [0], [1], [0, 0, 1, 1], [], []>} : vector<1x4xf32>, vector<4x128xf32>, vector<1x128xf32> -> vector<1x128xf32>
      %c0_29 = arith.constant 0 : index
      %c0_30 = arith.constant 0 : index
      %36 = vector.load %arg15[%c0_29, %c0_30] : memref<8x128xf32, #tpu.memory_space<vmem>>, vector<8x128xf32>
      %37 = vector.broadcast %33 : vector<1x128xf32> to vector<8x128xf32>
      %38 = arith.mulf %36, %37 : vector<8x128xf32>
      %c0_31 = arith.constant 0 : index
      %c0_32 = arith.constant 0 : index
      %39 = vector.load %arg7[%c0_31, %c0_32] : memref<128x128xf32, #tpu.memory_space<vmem>>, vector<128x128xf32>
      %cst_33 = arith.constant dense<0.000000e+00> : vector<8x128xf32>
      %40 = tpu.matmul %38, %39, %cst_33 {dimension_numbers = #tpu.dot_dimension_numbers<[1], [0], [0], [1], [0, 0, 1, 1], [], []>} : vector<8x128xf32>, vector<128x128xf32>, vector<8x128xf32> -> vector<8x128xf32>
      %cst_34 = arith.constant 0.000000e+00 : f32
      %41 = vector.broadcast %cst_34 : f32 to vector<8x128xf32>
      %42 = arith.maximumf %40, %41 : vector<8x128xf32>
      %43 = arith.truncf %42 : vector<8x128xf32> to vector<8x128xbf16>
      %c0_35 = arith.constant 0 : index
      %c0_36 = arith.constant 0 : index
      %c0_37 = arith.constant 0 : index
      %44 = vector.load %arg12[%c0_35, %c0_36, %c0_37] : memref<2x128x128xbf16, #tpu.memory_space<vmem>>, vector<1x128x128xbf16>
      %45 = vector.shape_cast %44 : vector<1x128x128xbf16> to vector<128x128xbf16>
      %cst_38 = arith.constant dense<0.000000e+00> : vector<8x128xf32>
      %46 = tpu.matmul %43, %45, %cst_38 {dimension_numbers = #tpu.dot_dimension_numbers<[1], [0], [0], [1], [0, 0, 1, 1], [], []>} : vector<8x128xbf16>, vector<128x128xbf16>, vector<8x128xf32> -> vector<8x128xf32>
      %47 = vector.broadcast %33 : vector<1x128xf32> to vector<8x128xf32>
      %48 = arith.mulf %46, %47 : vector<8x128xf32>
      %c0_39 = arith.constant 0 : index
      %c0_40 = arith.constant 0 : index
      %49 = vector.load %arg7[%c0_39, %c0_40] : memref<128x128xf32, #tpu.memory_space<vmem>>, vector<128x128xf32>
      %cst_41 = arith.constant dense<0.000000e+00> : vector<8x128xf32>
      %50 = tpu.matmul %48, %49, %cst_41 {dimension_numbers = #tpu.dot_dimension_numbers<[1], [0], [0], [1], [0, 0, 1, 1], [], []>} : vector<8x128xf32>, vector<128x128xf32>, vector<8x128xf32> -> vector<8x128xf32>
      %cst_42 = arith.constant dense<0.000000e+00> : vector<128xf32>
      %51 = vector.multi_reduction <add>, %50, %cst_42 [0] : vector<8x128xf32> to vector<128xf32>
      %52 = vector.shape_cast %51 : vector<128xf32> to vector<1x128xf32>
      %cst_43 = arith.constant 8.000000e+00 : f32
      %53 = vector.broadcast %cst_43 : f32 to vector<1x128xf32>
      %54 = arith.divf %52, %53 : vector<1x128xf32>
      %55 = vector.broadcast %54 : vector<1x128xf32> to vector<8x128xf32>
      %56 = arith.subf %50, %55 : vector<8x128xf32>
      %57 = arith.mulf %56, %56 : vector<8x128xf32>
      %cst_44 = arith.constant dense<0.000000e+00> : vector<128xf32>
      %58 = vector.multi_reduction <add>, %57, %cst_44 [0] : vector<8x128xf32> to vector<128xf32>
      %59 = vector.shape_cast %58 : vector<128xf32> to vector<1x128xf32>
      %cst_45 = arith.constant 8.000000e+00 : f32
      %60 = vector.broadcast %cst_45 : f32 to vector<1x128xf32>
      %61 = arith.divf %59, %60 : vector<1x128xf32>
      %62 = vector.broadcast %54 : vector<1x128xf32> to vector<8x128xf32>
      %63 = arith.subf %50, %62 : vector<8x128xf32>
      %cst_46 = arith.constant 9.99999974E-6 : f32
      %64 = vector.broadcast %cst_46 : f32 to vector<1x128xf32>
      %65 = arith.addf %61, %64 : vector<1x128xf32>
      %66 = math.rsqrt %65 : vector<1x128xf32>
      %67 = vector.broadcast %66 : vector<1x128xf32> to vector<8x128xf32>
      %68 = arith.mulf %63, %67 : vector<8x128xf32>
      %cst_47 = arith.constant 0.000000e+00 : f32
      %69 = vector.broadcast %cst_47 : f32 to vector<8x128xf32>
      %70 = arith.maximumf %68, %69 : vector<8x128xf32>
      %71 = arith.truncf %70 : vector<8x128xf32> to vector<8x128xbf16>
      %c1 = arith.constant 1 : index
      %c0_48 = arith.constant 0 : index
      %c0_49 = arith.constant 0 : index
      %72 = vector.load %arg12[%c1, %c0_48, %c0_49] : memref<2x128x128xbf16, #tpu.memory_space<vmem>>, vector<1x128x128xbf16>
      %73 = vector.shape_cast %72 : vector<1x128x128xbf16> to vector<128x128xbf16>
      %cst_50 = arith.constant dense<0.000000e+00> : vector<8x128xf32>
      %74 = tpu.matmul %71, %73, %cst_50 {dimension_numbers = #tpu.dot_dimension_numbers<[1], [0], [0], [1], [0, 0, 1, 1], [], []>} : vector<8x128xbf16>, vector<128x128xbf16>, vector<8x128xf32> -> vector<8x128xf32>
      %75 = vector.broadcast %33 : vector<1x128xf32> to vector<8x128xf32>
      %76 = arith.mulf %74, %75 : vector<8x128xf32>
      %c0_51 = arith.constant 0 : index
      %c0_52 = arith.constant 0 : index
      %77 = vector.load %arg7[%c0_51, %c0_52] : memref<128x128xf32, #tpu.memory_space<vmem>>, vector<128x128xf32>
      %cst_53 = arith.constant dense<0.000000e+00> : vector<8x128xf32>
      %78 = tpu.matmul %76, %77, %cst_53 {dimension_numbers = #tpu.dot_dimension_numbers<[1], [0], [0], [1], [0, 0, 1, 1], [], []>} : vector<8x128xf32>, vector<128x128xf32>, vector<8x128xf32> -> vector<8x128xf32>
      %cst_54 = arith.constant dense<0.000000e+00> : vector<128xf32>
      %79 = vector.multi_reduction <add>, %78, %cst_54 [0] : vector<8x128xf32> to vector<128xf32>
      %80 = vector.shape_cast %79 : vector<128xf32> to vector<1x128xf32>
      %cst_55 = arith.constant 8.000000e+00 : f32
      %81 = vector.broadcast %cst_55 : f32 to vector<1x128xf32>
      %82 = arith.divf %80, %81 : vector<1x128xf32>
      %83 = vector.broadcast %82 : vector<1x128xf32> to vector<8x128xf32>
      %84 = arith.subf %78, %83 : vector<8x128xf32>
      %85 = arith.mulf %84, %84 : vector<8x128xf32>
      %cst_56 = arith.constant dense<0.000000e+00> : vector<128xf32>
      %86 = vector.multi_reduction <add>, %85, %cst_56 [0] : vector<8x128xf32> to vector<128xf32>
      %87 = vector.shape_cast %86 : vector<128xf32> to vector<1x128xf32>
      %cst_57 = arith.constant 8.000000e+00 : f32
      %88 = vector.broadcast %cst_57 : f32 to vector<1x128xf32>
      %89 = arith.divf %87, %88 : vector<1x128xf32>
      %90 = vector.broadcast %82 : vector<1x128xf32> to vector<8x128xf32>
      %91 = arith.subf %78, %90 : vector<8x128xf32>
      %cst_58 = arith.constant 9.99999974E-6 : f32
      %92 = vector.broadcast %cst_58 : f32 to vector<1x128xf32>
      %93 = arith.addf %89, %92 : vector<1x128xf32>
      %94 = math.rsqrt %93 : vector<1x128xf32>
      %95 = vector.broadcast %94 : vector<1x128xf32> to vector<8x128xf32>
      %96 = arith.mulf %91, %95 : vector<8x128xf32>
      %cst_59 = arith.constant 0.000000e+00 : f32
      %97 = vector.broadcast %cst_59 : f32 to vector<8x128xf32>
      %98 = arith.maximumf %96, %97 : vector<8x128xf32>
      %99 = arith.truncf %98 : vector<8x128xf32> to vector<8x128xbf16>
      %c0_60 = arith.constant 0 : index
      %c0_61 = arith.constant 0 : index
      %100 = vector.load %arg13[%c0_60, %c0_61] : memref<128x128xbf16, #tpu.memory_space<vmem>>, vector<128x128xbf16>
      %cst_62 = arith.constant dense<0.000000e+00> : vector<8x128xf32>
      %101 = tpu.matmul %99, %100, %cst_62 {dimension_numbers = #tpu.dot_dimension_numbers<[1], [0], [0], [1], [0, 0, 1, 1], [], []>} : vector<8x128xbf16>, vector<128x128xbf16>, vector<8x128xf32> -> vector<8x128xf32>
      %102 = vector.broadcast %35 : vector<1x128xf32> to vector<8x128xf32>
      %103 = arith.mulf %101, %102 : vector<8x128xf32>
      %c0_63 = arith.constant 0 : index
      %c0_64 = arith.constant 0 : index
      %104 = vector.load %arg9[%c0_63, %c0_64] : memref<128x128xf32, #tpu.memory_space<vmem>>, vector<128x128xf32>
      %cst_65 = arith.constant dense<0.000000e+00> : vector<8x128xf32>
      %105 = tpu.matmul %103, %104, %cst_65 {dimension_numbers = #tpu.dot_dimension_numbers<[1], [0], [0], [1], [0, 0, 1, 1], [], []>} : vector<8x128xf32>, vector<128x128xf32>, vector<8x128xf32> -> vector<8x128xf32>
      %c0_66 = arith.constant 0 : index
      %c0_67 = arith.constant 0 : index
      %106 = vector.load %arg14[%c0_66, %c0_67] : memref<8x128xf32, #tpu.memory_space<vmem>>, vector<8x128xf32>
      tpu.vector_store %arg14[%c0_66, %c0_67], %105 {strides = array<i32>} : memref<8x128xf32, #tpu.memory_space<vmem>>, vector<8x128xf32>,
    } else {
    }
    return
  }
  func.func @transform_0(%arg0: i32) -> (i32, i32) {
    %c0_i32 = arith.constant 0 : i32
    %c0_i32_0 = arith.constant 0 : i32
    %c0_i32_1 = arith.constant 0 : i32
    return %c0_i32, %c0_i32_0 : i32, i32
  }
  func.func @transform_1(%arg0: i32) -> (i32, i32) {
    %c0_i32 = arith.constant 0 : i32
    %c0_i32_0 = arith.constant 0 : i32
    %c0_i32_1 = arith.constant 0 : i32
    return %c0_i32, %c0_i32_0 : i32, i32
  }
  func.func @transform_2(%arg0: i32) -> (i32, i32) {
    %c0_i32 = arith.constant 0 : i32
    %c0_i32_0 = arith.constant 0 : i32
    %c0_i32_1 = arith.constant 0 : i32
    return %c0_i32, %c0_i32_0 : i32, i32
  }
  func.func @transform_3(%arg0: i32) -> (i32, i32) {
    %c0_i32 = arith.constant 0 : i32
    %c0_i32_0 = arith.constant 0 : i32
    %c0_i32_1 = arith.constant 0 : i32
    return %c0_i32, %c0_i32_0 : i32, i32
  }
  func.func @transform_4(%arg0: i32) -> (i32, i32) {
    %c0_i32 = arith.constant 0 : i32
    %c0_i32_0 = arith.constant 0 : i32
    %c0_i32_1 = arith.constant 0 : i32
    return %c0_i32, %c0_i32_0 : i32, i32
  }
  func.func @transform_5(%arg0: i32) -> (i32, i32) {
    %c0_i32 = arith.constant 0 : i32
    %c0_i32_0 = arith.constant 0 : i32
    %c0_i32_1 = arith.constant 0 : i32
    return %c0_i32, %c0_i32_0 : i32, i32
  }
  func.func @transform_6(%arg0: i32) -> (i32, i32) {
    %c0_i32 = arith.constant 0 : i32
    %c0_i32_0 = arith.constant 0 : i32
    %c0_i32_1 = arith.constant 0 : i32
    return %c0_i32, %c0_i32_0 : i32, i32
  }
  func.func @transform_7(%arg0: i32) -> (i32, i32) {
    %c0_i32 = arith.constant 0 : i32
    %c0_i32_0 = arith.constant 0 : i32
    %c0_i32_1 = arith.constant 0 : i32
    return %c0_i32, %c0_i32_0 : i32, i32
  }
  func.func @transform_8(%arg0: i32) -> (i32, i32) {
    %c0_i32 = arith.constant 0 : i32
    %c0_i32_0 = arith.constant 0 : i32
    %c0_i32_1 = arith.constant 0 : i32
    return %c0_i32, %c0_i32_0 : i32, i32
  }
  func.func @transform_9(%arg0: i32) -> (i32, i32) {
    %c0_i32 = arith.constant 0 : i32
    %c0_i32_0 = arith.constant 0 : i32
    return %c0_i32, %arg0 : i32, i32
  }
  func.func @transform_10(%arg0: i32) -> (i32, i32) {
    %c0_i32 = arith.constant 0 : i32
    %c0_i32_0 = arith.constant 0 : i32
    return %arg0, %c0_i32 : i32, i32
  }
  func.func @transform_11(%arg0: i32) -> (i32, i32, i32) {
    %c0_i32 = arith.constant 0 : i32
    %c0_i32_0 = arith.constant 0 : i32
    %c0_i32_1 = arith.constant 0 : i32
    %c0_i32_2 = arith.constant 0 : i32
    return %c0_i32, %c0_i32_0, %c0_i32_1 : i32, i32, i32
  }
  func.func @transform_12(%arg0: i32) -> (i32, i32) {
    %c0_i32 = arith.constant 0 : i32
    %c0_i32_0 = arith.constant 0 : i32
    %c0_i32_1 = arith.constant 0 : i32
    return %c0_i32, %c0_i32_0 : i32, i32
  }
  func.func @transform_13(%arg0: i32) -> (i32, i32) {
    %c0_i32 = arith.constant 0 : i32
    %c0_i32_0 = arith.constant 0 : i32
    %c0_i32_1 = arith.constant 0 : i32
    return %c0_i32, %c0_i32_0 : i32, i32
  }
}

</mosaic_0001>

<bundles_post_ra>
// kernel: tpu_custom_call.1
= control target key start
LH: loop header
LB: loop body
LE: loop exit
PB: predicated region body
PF: predicated region fallthrough
CT: control target
= control target key end

     0   :  { %18 = vsyncpa [#allocation4], 0  ;;  %s4894_s0 = inlined_call_operand.vmem [shape: f32[1,8], index: 0, kind: input, shape index: {}]   ;;  %s4895_s1 = inlined_call_operand.vmem [shape: f32[8,64], index: 1, kind: input, shape index: {}]   ;;  %s4896_s2 = inlined_call_operand.vmem [shape: f32[1,64], index: 2, kind: input, shape index: {}]   ;;  %s4897_s3 = inlined_call_operand.vmem [shape: f32[64,4], index: 3, kind: input, shape index: {}]   ;;  %s4898_s4 = inlined_call_operand.vmem [shape: f32[1,4], index: 4, kind: input, shape index: {}]   ;;  %s4899_s5 = inlined_call_operand.vmem [shape: f32[4,128], index: 5, kind: input, shape index: {}]   ;;  %s4900_s6 = inlined_call_operand.hbm [shape: f32[128,128], index: 6, kind: input, shape index: {}]   ;;  %s4901_s7 = inlined_call_operand.vmem [shape: f32[4,128], index: 7, kind: input, shape index: {}]   ;;  %s4902_s8 = inlined_call_operand.hbm [shape: f32[128,128], index: 8, kind: input, shape index: {}]   ;;  %s4903_s9 = inlined_call_operand.hbm [shape: bf16[8,3072], index: 9, kind: input, shape index: {}]   ;;  %s4904_s10 = inlined_call_operand.hbm [shape: bf16[3072,128], index: 10, kind: input, shape index: {}]   ;;  %s4905_s11 = inlined_call_operand.hbm [shape: bf16[2,128,128], index: 11, kind: input, shape index: {}]   ;;  %s4906_s12 = inlined_call_operand.vmem [shape: bf16[128,128], index: 12, kind: input, shape index: {}]   ;;  %s4907_s13 = inlined_call_operand.hbm [shape: f32[8,128], index: 13, kind: output, shape index: {}]  }
   0x1   :  { %19 = vsyncpa [#allocation7], 0 }
   0x2   :  { %20 = vsyncpa [#allocation10], 0 }
   0x3   :  { %21 = vsyncpa [#allocation5], 0  ;;  %s4508_s25 = smov [#allocation6]   ;;  %s4509_s27 = smov [#allocation9]  }
   0x4   :  { %s53_s26 = sshll.u32 %s4508_s25, 4  ;;  %s75_s28 = sshll.u32 %s4509_s27, 4  ;;  %s54_s26 = int_to_ptr.vmem [resolvable:$true] %s53_s26  ;;  %s76_s28 = int_to_ptr.vmem [resolvable:$true] %s75_s28 }
   0x5   :  { %s4388_s29 = scalar_lea.vmem %s54_s26, 2048  ;;  %p4393_p1 = scmp.lt.s32.totalorder %s54_s26, %s54_s26 }
   0x6   :  { %p4389_p0 = scmp.ne.s32.totalorder %s54_s26, %s4388_s29  ;;  %p4394_p2 = scmp.lt.s32.totalorder %s4388_s29, %s4388_s29 }
   0x8   :  { %p4395_p3 = por %p4394_p2, %p4393_p1 }
   0xa   :  { %p4396_p4 = pnand %p4395_p3, %p4389_p0 }
   0xc   :  { %4399 = shalt.err (!%p4396_p4)
}
   0xd   :  { %s4510_s30 = smov 128   ;;  %s4511_s14 = smov 8  }
   0xe   :  { %59 = dma.hbm_to_vmem [thread:$0]  %s4902_s8, 2048, %s54_s26, [#allocation7], %s4510_s30, %s4510_s30, %s4511_s14  }
   0xf   :  { %s4408_s17 = scalar_lea.vmem %s76_s28, 24576  ;;  %p4413_p6 = scmp.lt.s32.totalorder %s76_s28, %s76_s28 }
  0x10   :  { %p4409_p5 = scmp.ne.s32.totalorder %s76_s28, %s4408_s17  ;;  %p4414_p7 = scmp.lt.s32.totalorder %s4408_s17, %s4408_s17 }
  0x12   :  { %p4415_p8 = por %p4414_p7, %p4413_p6 }
  0x14   :  { %p4416_p9 = pnand %p4415_p8, %p4409_p5 }
  0x16   :  { %4419 = shalt.err (!%p4416_p9)
}
  0x17   :  { %s4512_s18 = smov 64   ;;  %s4513_s19 = smov 4  }
  0x18   :  { %81 = dma.hbm_to_vmem [thread:$0]  %s4904_s10, 24576, %s76_s28, [#allocation10], %s4512_s18, %s4512_s18, %s4513_s19  }
  0x19   :  { %s4514_s22 = smov [#allocation3]   ;;  %s4515_s24 = smov [#allocation8]  }
  0x1a   :  { %s39_s23 = sshll.u32 %s4514_s22, 4  ;;  %s66_s8 = sshll.u32 %s4515_s24, 4  ;;  %s40_s23 = int_to_ptr.vmem [resolvable:$true] %s39_s23  ;;  %s67_s8 = int_to_ptr.vmem [resolvable:$true] %s66_s8 }
  0x1b   :  { %s4428_s25 = scalar_lea.vmem %s40_s23, 2048  ;;  %p4433_p11 = scmp.lt.s32.totalorder %s40_s23, %s40_s23 }
  0x1c   :  { %p4429_p10 = scmp.ne.s32.totalorder %s40_s23, %s4428_s25  ;;  %p4434_p12 = scmp.lt.s32.totalorder %s4428_s25, %s4428_s25 }
  0x1e   :  { %p4435_p13 = por %p4434_p12, %p4433_p11 }
  0x20   :  { %p4436_p0 = pnand %p4435_p13, %p4429_p10 }
  0x22   :  { %4439 = shalt.err (!%p4436_p0)
}
  0x23   :  { %45 = dma.hbm_to_vmem [thread:$0]  %s4900_s6, 2048, %s40_s23, [#allocation4], %s4510_s30, %s4510_s30, %s4511_s14  }
  0x24   :  { %s4448_s29 = scalar_lea.vmem %s67_s8, 1536  ;;  %p4453_p2 = scmp.lt.s32.totalorder %s67_s8, %s67_s8 }
  0x25   :  { %p4449_p1 = scmp.ne.s32.totalorder %s67_s8, %s4448_s29  ;;  %p4454_p3 = scmp.lt.s32.totalorder %s4448_s29, %s4448_s29 }
  0x27   :  { %p4455_p4 = por %p4454_p3, %p4453_p2 }
  0x29   :  { %p4456_p5 = pnand %p4455_p4, %p4449_p1 }
  0x2b   :  { %4459 = shalt.err (!%p4456_p5)
}
  0x2c   :  { %69 = dma.hbm_to_vmem [thread:$0]  %s4903_s9, 1536, %s67_s8, [#allocation7]  }
  0x2d   :  { %s4516_s15 = smov [#allocation11]  }
  0x2e   :  { %s87_s16 = sshll.u32 %s4516_s15, 4  ;;  %s88_s16 = int_to_ptr.vmem [resolvable:$true] %s87_s16 }
  0x2f   :  { %s4468_s17 = scalar_lea.vmem %s88_s16, 2048  ;;  %p4473_p7 = scmp.lt.s32.totalorder %s88_s16, %s88_s16 }
  0x30   :  { %p4469_p6 = scmp.ne.s32.totalorder %s88_s16, %s4468_s17  ;;  %p4474_p8 = scmp.lt.s32.totalorder %s4468_s17, %s4468_s17 }
  0x32   :  { %p4475_p9 = por %p4474_p8, %p4473_p7 }
  0x34   :  { %p4476_p10 = pnand %p4475_p9, %p4469_p6 }
  0x36   :  { %4479 = shalt.err (!%p4476_p10)
}
  0x37   :  { %93 = dma.hbm_to_vmem [thread:$0]  %s4905_s11, 2048, %s88_s16, [#allocation10], %s4512_s18, %s4512_s18, %s4513_s19  }
  0x38   :  { %4500 = dma.done.wait [#allocation4], 2048  }
  0x39   :  { %4501 = vsyncadd [#allocation4], 4294965248 }
  0x3a   :  { %4502 = dma.done.wait [#allocation7], 3584  }
  0x3b   :  { %4503 = vsyncadd [#allocation7], 4294963712 }
  0x3c   :  { %4504 = dma.done.wait [#allocation10], 26624  }
  0x3d   :  { %4505 = vsyncadd [#allocation10], 4294940672  ;;  %v4132_v0 = vld [vmem:[#allocation9 + $0x78] sm:$0xff]   ;;  %v4136_v4 = vld [vmem:[#allocation9 + $0x70] sm:$0xff]   ;;  %vm2242_vm0 = vcmask 64512   ;;  %vm4518_vm1 = vmmov 0  }
  0x3e   :  { %v4133_v1 = vld [vmem:[#allocation9 + $0xf8] sm:$0xff]   ;;  %3512 = vmatprep.subr.bf16.mxu0 %v4132_v0  ;;  %v4137_v5 = vld [vmem:[#allocation9 + $0xf0] sm:$0xff]   ;;  %v4140_v8 = vld [vmem:[#allocation9 + $0x68] sm:$0xff]   ;;  %vm2326_vm2 = vcmask 523264   ;;  %vm2400_vm3 = vcmask 24576   ;;  %vm2417_vm4 = vcmask 1043456  }
  0x3f   :  { %v4134_v2 = vld [vmem:[#allocation9 + $0x38] sm:$0xff]   ;;  %3534 = vmatprep.subr.bf16.mxu1 %v4133_v1  ;;  %v4138_v6 = vld [vmem:[#allocation9 + $0x30] sm:$0xff]   ;;  %v4141_v9 = vld [vmem:[#allocation9 + $0xe8] sm:$0xff]   ;;  %vm2413_vm5 = vcmask 31744  }
  0x40   :  { %v4135_v3 = vld [vmem:[#allocation9 + $0xb8] sm:$0xff]   ;;  %3513 = vmatpush3.bf16.msra.mxu0 %v4134_v2  ;;  %v4139_v7 = vld [vmem:[#allocation9 + $0xb0] sm:$0xff]   ;;  %v4142_v10 = vld [vmem:[#allocation9 + $0x28] sm:$0xff]  }
  0x41   :  { %3535 = vmatpush3.bf16.msra.mxu1 %v4135_v3  ;;  %3514 = vmatprep.subr.bf16.mxu0 %v4136_v4  ;;  %v4143_v11 = vld [vmem:[#allocation9 + $0xa8] sm:$0xff]   ;;  %v4144_v12 = vld [vmem:[#allocation9 + $0x60] sm:$0xff]   ;;  %v4148_v16 = vld [vmem:[#allocation9 + $0x58] sm:$0xff]  }
  0x42   :  { %3536 = vmatprep.subr.bf16.mxu1 %v4137_v5  ;;  %v4145_v13 = vld [vmem:[#allocation9 + $0xe0] sm:$0xff]   ;;  %v4149_v17 = vld [vmem:[#allocation9 + $0xd8] sm:$0xff]   ;;  %v4152_v20 = vld [vmem:[#allocation9 + $0x50] sm:$0xff]  }
  0x43   :  { %v4146_v14 = vld [vmem:[#allocation9 + $0x20] sm:$0xff]   ;;  %v4150_v18 = vld [vmem:[#allocation9 + $0x18] sm:$0xff]   ;;  %v4153_v21 = vld [vmem:[#allocation9 + $0xd0] sm:$0xff]  }
  0x44   :  { %3515 = vmatpush3.bf16.msra.mxu0 %v4138_v6  ;;  %v4147_v15 = vld [vmem:[#allocation9 + $0xa0] sm:$0xff]   ;;  %v4151_v19 = vld [vmem:[#allocation9 + $0x98] sm:$0xff]   ;;  %v4154_v22 = vld [vmem:[#allocation9 + $0x10] sm:$0xff]  }
  0x45   :  { %3537 = vmatpush3.bf16.msra.mxu1 %v4139_v7  ;;  %3516 = vmatprep.subr.bf16.mxu0 %v4140_v8  ;;  %v4155_v23 = vld [vmem:[#allocation9 + $0x90] sm:$0xff]   ;;  %v4156_v24 = vld [vmem:[#allocation9 + $0x48] sm:$0xff]   ;;  %v4160_v28 = vld [vmem:[#allocation9 + $0x40] sm:$0xff]  }
  0x46   :  { %3538 = vmatprep.subr.bf16.mxu1 %v4141_v9  ;;  %v4157_v25 = vld [vmem:[#allocation9 + $0xc8] sm:$0xff]   ;;  %v4161_v29 = vld [vmem:[#allocation9 + $0xc0] sm:$0xff]   ;;  %v4168_v38 = vld [vmem:[#allocation9 + $0x178] sm:$0xff]  }
  0x47   :  { %v4158_v26 = vld [vmem:[#allocation9 + $0x8] sm:$0xff]   ;;  %v4162_v30 = vld [vmem:[#allocation9] sm:$0xff]   ;;  %v4169_v39 = vld [vmem:[#allocation9 + $0x1f8] sm:$0xff]  }
  0x48   :  { %3517 = vmatpush3.bf16.msra.mxu0 %v4142_v10  ;;  %v4159_v27 = vld [vmem:[#allocation9 + $0x88] sm:$0xff]   ;;  %v4163_v31 = vld [vmem:[#allocation9 + $0x80] sm:$0xff]   ;;  %v4170_v40 = vld [vmem:[#allocation9 + $0x138] sm:$0xff]  }
  0x49   :  { %3539 = vmatpush3.bf16.msra.mxu1 %v4143_v11  ;;  %3518 = vmatprep.subr.bf16.mxu0 %v4144_v12  ;;  %v112_v32 = vld [vmem:[#allocation8] sm:$0xff]  ;;  %v113_v33 = vld [vmem:[#allocation8 + $0x8] sm:$0xff]  ;;  %v4171_v41 = vld [vmem:[#allocation9 + $0x1b8] sm:$0xff]  }
  0x4a   :  { %3540 = vmatprep.subr.bf16.mxu1 %v4145_v13  ;;  %v3266_v34 = vcombine.low %v112_v32, %v112_v32  ;;  %v3267_v35 = vcombine.high %v112_v32, %v112_v32  ;;  %v3268_v36 = vcombine.low %v113_v33, %v113_v33  ;;  %v3269_v37 = vcombine.high %v113_v33, %v113_v33  ;;  %v4172_v42 = vld [vmem:[#allocation9 + $0x170] sm:$0xff]   ;;  %v4176_v46 = vld [vmem:[#allocation9 + $0x168] sm:$0xff]   ;;  %v4180_v50 = vld [vmem:[#allocation9 + $0x160] sm:$0xff]  }
  0x4b   :  { %v4173_v43 = vld [vmem:[#allocation9 + $0x1f0] sm:$0xff]   ;;  %v4177_v47 = vld [vmem:[#allocation9 + $0x1e8] sm:$0xff]   ;;  %v4181_v51 = vld [vmem:[#allocation9 + $0x1e0] sm:$0xff]  }
  0x4c   :  { %3519 = vmatpush3.bf16.msra.mxu0 %v4146_v14  ;;  %1776 = vmatprep.mubr.bf16.mxu0 %v3267_v35  ;;  %v4174_v44 = vld [vmem:[#allocation9 + $0x130] sm:$0xff]   ;;  %v4178_v48 = vld [vmem:[#allocation9 + $0x128] sm:$0xff]   ;;  %v4182_v52 = vld [vmem:[#allocation9 + $0x120] sm:$0xff]  }
  0x4d   :  { %3541 = vmatpush3.bf16.msra.mxu1 %v4147_v15  ;;  %3520 = vmatprep.subr.bf16.mxu0 %v4148_v16  ;;  %v4175_v45 = vld [vmem:[#allocation9 + $0x1b0] sm:$0xff]   ;;  %v4179_v49 = vld [vmem:[#allocation9 + $0x1a8] sm:$0xff]   ;;  %v4183_v53 = vld [vmem:[#allocation9 + $0x1a0] sm:$0xff]  }
  0x4e   :  { %3542 = vmatprep.subr.bf16.mxu1 %v4149_v17  ;;  %1816 = vmatprep.mubr.bf16.mxu1 %v3269_v37  ;;  %v4184_v54 = vld [vmem:[#allocation9 + $0x158] sm:$0xff]   ;;  %v4188_v58 = vld [vmem:[#allocation9 + $0x150] sm:$0xff]   ;;  %v4192_v62 = vld [vmem:[#allocation9 + $0x148] sm:$0xff]  }
  0x4f   :  { %v4185_v55 = vld [vmem:[#allocation9 + $0x1d8] sm:$0xff]   ;;  %v4189_v59 = vld [vmem:[#allocation9 + $0x1d0] sm:$0xff]   ;;  %v4193_v63 = vld [vmem:[#allocation9 + $0x1c8] sm:$0xff]  }
  0x50   :  { %3521 = vmatpush3.bf16.msra.mxu0 %v4150_v18  ;;  %v4186_v56 = vld [vmem:[#allocation9 + $0x118] sm:$0xff]   ;;  %v4190_v60 = vld [vmem:[#allocation9 + $0x110] sm:$0xff]   ;;  %v4194_v0 = vld [vmem:[#allocation9 + $0x108] sm:$0xff]  }
  0x51   :  { %3543 = vmatpush3.bf16.msra.mxu1 %v4151_v19  ;;  %3522 = vmatprep.subr.bf16.mxu0 %v4152_v20  ;;  %v4187_v57 = vld [vmem:[#allocation9 + $0x198] sm:$0xff]   ;;  %v4191_v61 = vld [vmem:[#allocation9 + $0x190] sm:$0xff]   ;;  %v4195_v1 = vld [vmem:[#allocation9 + $0x188] sm:$0xff]  }
  0x52   :  { %3544 = vmatprep.subr.bf16.mxu1 %v4153_v21  ;;  %v4196_v2 = vld [vmem:[#allocation9 + $0x140] sm:$0xff]   ;;  %v114_v6 = vld [vmem:[#allocation8 + $0x10] sm:$0xff]  ;;  %v115_v9 = vld [vmem:[#allocation8 + $0x18] sm:$0xff] }
  0x53   :  { %v4197_v3 = vld [vmem:[#allocation9 + $0x1c0] sm:$0xff]   ;;  %v3270_v7 = vcombine.low %v114_v6, %v114_v6  ;;  %v3271_v8 = vcombine.high %v114_v6, %v114_v6  ;;  %v3272_v10 = vcombine.low %v115_v9, %v115_v9  ;;  %v3273_v11 = vcombine.high %v115_v9, %v115_v9  ;;  %v4204_v12 = vld [vmem:[#allocation9 + $0x278] sm:$0xff]   ;;  %v4208_v16 = vld [vmem:[#allocation9 + $0x270] sm:$0xff]  }
  0x54   :  { %3523 = vmatpush3.bf16.msra.mxu0 %v4154_v22  ;;  %v4198_v4 = vld [vmem:[#allocation9 + $0x100] sm:$0xff]   ;;  %v4205_v13 = vld [vmem:[#allocation9 + $0x2f8] sm:$0xff]   ;;  %v4209_v17 = vld [vmem:[#allocation9 + $0x2f0] sm:$0xff]  }
  0x55   :  { %3545 = vmatpush3.bf16.msra.mxu1 %v4155_v23  ;;  %3524 = vmatprep.subr.bf16.mxu0 %v4156_v24  ;;  %v4199_v5 = vld [vmem:[#allocation9 + $0x180] sm:$0xff]   ;;  %v4206_v14 = vld [vmem:[#allocation9 + $0x238] sm:$0xff]   ;;  %v4210_v18 = vld [vmem:[#allocation9 + $0x230] sm:$0xff]  }
  0x56   :  { %3546 = vmatprep.subr.bf16.mxu1 %v4157_v25  ;;  %v4207_v15 = vld [vmem:[#allocation9 + $0x2b8] sm:$0xff]   ;;  %v4211_v19 = vld [vmem:[#allocation9 + $0x2b0] sm:$0xff]   ;;  %v4212_v20 = vld [vmem:[#allocation9 + $0x268] sm:$0xff]  }
  0x57   :  { %v4213_v21 = vld [vmem:[#allocation9 + $0x2e8] sm:$0xff]   ;;  %v4216_v24 = vld [vmem:[#allocation9 + $0x260] sm:$0xff]   ;;  %v4224_v32 = vld [vmem:[#allocation9 + $0x250] sm:$0xff]  }
  0x58   :  { %3525 = vmatpush3.bf16.msra.mxu0 %v4158_v26  ;;  %v4214_v22 = vld [vmem:[#allocation9 + $0x228] sm:$0xff]   ;;  %v4217_v25 = vld [vmem:[#allocation9 + $0x2e0] sm:$0xff]   ;;  %v4225_v33 = vld [vmem:[#allocation9 + $0x2d0] sm:$0xff]  }
  0x59   :  { %3547 = vmatpush3.bf16.msra.mxu1 %v4159_v27  ;;  %3526 = vmatprep.subr.bf16.mxu0 %v4160_v28  ;;  %v4215_v23 = vld [vmem:[#allocation9 + $0x2a8] sm:$0xff]   ;;  %v4218_v26 = vld [vmem:[#allocation9 + $0x220] sm:$0xff]   ;;  %v4220_v28 = vld [vmem:[#allocation9 + $0x258] sm:$0xff]  }
  0x5a   :  { %3548 = vmatprep.subr.bf16.mxu1 %v4161_v29  ;;  %v4219_v27 = vld [vmem:[#allocation9 + $0x2a0] sm:$0xff]   ;;  %v4221_v29 = vld [vmem:[#allocation9 + $0x2d8] sm:$0xff]   ;;  %v4227_v35 = vld [vmem:[#allocation9 + $0x290] sm:$0xff]  }
  0x5b   :  { %v4229_v37 = vld [vmem:[#allocation9 + $0x2c8] sm:$0xff]   ;;  %v4260_v6 = vld [vmem:[#allocation9 + $0x350] sm:$0xff]  }
  0x5c   :  { %3527 = vmatpush3.bf16.msra.mxu0 %v4162_v30  ;;  %v4222_v30 = vld [vmem:[#allocation9 + $0x218] sm:$0xff]   ;;  %v4263_v9 = vld [vmem:[#allocation9 + $0x390] sm:$0xff]  }
  0x5d   :  { %3549 = vmatpush3.bf16.msra.mxu1 %v4163_v31  ;;  %3556 = vmatprep.subr.bf16.mxu0 %v4168_v38  ;;  %v4223_v31 = vld [vmem:[#allocation9 + $0x298] sm:$0xff]   ;;  %v4230_v38 = vld [vmem:[#allocation9 + $0x208] sm:$0xff]  }
  0x5e   :  { %3578 = vmatprep.subr.bf16.mxu1 %v4169_v39  ;;  %v4231_v39 = vld [vmem:[#allocation9 + $0x288] sm:$0xff]  }
  0x5f   :  { %1777 = vmatmul.mubr.bf16.vlgmr.msra.gmra.mxu0 %v3266_v34  ;;  %v4226_v34 = vld [vmem:[#allocation9 + $0x210] sm:$0xff]  }
  0x60   :  { %1817 = vmatmul.mubr.bf16.vlgmr.msra.gmra.mxu1 %v3268_v36  ;;  %3557 = vmatpush3.bf16.msra.mxu0 %v4170_v40  ;;  %v4228_v36 = vld [vmem:[#allocation9 + $0x248] sm:$0xff]   ;;  %v4232_v40 = vld [vmem:[#allocation9 + $0x240] sm:$0xff]  }
  0x61   :  { %3579 = vmatpush3.bf16.msra.mxu1 %v4171_v41  ;;  %3558 = vmatprep.subr.bf16.mxu0 %v4172_v42  ;;  %v4233_v41 = vld [vmem:[#allocation9 + $0x2c0] sm:$0xff]  }
  0x62   :  { %3580 = vmatprep.subr.bf16.mxu1 %v4173_v43  ;;  %1856 = vmatprep.mubr.bf16.mxu0 %v3271_v8  ;;  %v4234_v42 = vld [vmem:[#allocation9 + $0x200] sm:$0xff]   ;;  %v4262_v8 = vld [vmem:[#allocation9 + $0x310] sm:$0xff]  }
  0x63   :  { %1896 = vmatprep.mubr.bf16.mxu1 %v3273_v11  ;;  %v4235_v43 = vld [vmem:[#allocation9 + $0x280] sm:$0xff]   ;;  %v4265_v11 = vld [vmem:[#allocation9 + $0x3c8] sm:$0xff]  }
  0x64   :  { %3559 = vmatpush3.bf16.msra.mxu0 %v4174_v44  ;;  %v116_v44 = vld [vmem:[#allocation8 + $0x20] sm:$0xff] }
  0x65   :  { %3581 = vmatpush3.bf16.msra.mxu1 %v4175_v45  ;;  %3560 = vmatprep.subr.bf16.mxu0 %v4176_v46  ;;  %v117_v45 = vld [vmem:[#allocation8 + $0x28] sm:$0xff]  ;;  %v3274_v46 = vcombine.low %v116_v44, %v116_v44 }
  0x66   :  { %3582 = vmatprep.subr.bf16.mxu1 %v4177_v47  ;;  %v3275_v47 = vcombine.high %v116_v44, %v116_v44  ;;  %v4296_v44 = vld [vmem:[#allocation9 + $0x450] sm:$0xff]  }
  0x68   :  { %3561 = vmatpush3.bf16.msra.mxu0 %v4178_v48  ;;  %v3276_v48 = vcombine.low %v117_v45, %v117_v45 }
  0x69   :  { %3583 = vmatpush3.bf16.msra.mxu1 %v4179_v49  ;;  %3562 = vmatprep.subr.bf16.mxu0 %v4180_v50  ;;  %v3277_v49 = vcombine.high %v117_v45, %v117_v45  ;;  %v4240_v50 = vld [vmem:[#allocation9 + $0x378] sm:$0xff]   ;;  %v4297_v45 = vld [vmem:[#allocation9 + $0x4d0] sm:$0xff]  }
  0x6a   :  { %3584 = vmatprep.subr.bf16.mxu1 %v4181_v51  ;;  %v4241_v51 = vld [vmem:[#allocation9 + $0x3f8] sm:$0xff]  }
  0x6c   :  { %3563 = vmatpush3.bf16.msra.mxu0 %v4182_v52  ;;  %v4242_v52 = vld [vmem:[#allocation9 + $0x338] sm:$0xff]  }
  0x6d   :  { %3585 = vmatpush3.bf16.msra.mxu1 %v4183_v53  ;;  %3564 = vmatprep.subr.bf16.mxu0 %v4184_v54  ;;  %v4243_v53 = vld [vmem:[#allocation9 + $0x3b8] sm:$0xff]   ;;  %v4244_v54 = vld [vmem:[#allocation9 + $0x370] sm:$0xff]  }
  0x6e   :  { %3586 = vmatprep.subr.bf16.mxu1 %v4185_v55  ;;  %v4245_v55 = vld [vmem:[#allocation9 + $0x3f0] sm:$0xff]  }
  0x70   :  { %3565 = vmatpush3.bf16.msra.mxu0 %v4186_v56  ;;  %v4246_v56 = vld [vmem:[#allocation9 + $0x330] sm:$0xff]  }
  0x71   :  { %3587 = vmatpush3.bf16.msra.mxu1 %v4187_v57  ;;  %3566 = vmatprep.subr.bf16.mxu0 %v4188_v58  ;;  %v4247_v57 = vld [vmem:[#allocation9 + $0x3b0] sm:$0xff]   ;;  %v4248_v58 = vld [vmem:[#allocation9 + $0x368] sm:$0xff]  }
  0x72   :  { %3588 = vmatprep.subr.bf16.mxu1 %v4189_v59  ;;  %v4249_v59 = vld [vmem:[#allocation9 + $0x3e8] sm:$0xff]  }
  0x74   :  { %3567 = vmatpush3.bf16.msra.mxu0 %v4190_v60  ;;  %v4250_v60 = vld [vmem:[#allocation9 + $0x328] sm:$0xff]  }
  0x75   :  { %3589 = vmatpush3.bf16.msra.mxu1 %v4191_v61  ;;  %3568 = vmatprep.subr.bf16.mxu0 %v4192_v62  ;;  %v4251_v61 = vld [vmem:[#allocation9 + $0x3a8] sm:$0xff]   ;;  %v4252_v62 = vld [vmem:[#allocation9 + $0x360] sm:$0xff]  }
  0x76   :  { %3590 = vmatprep.subr.bf16.mxu1 %v4193_v63  ;;  %v4253_v63 = vld [vmem:[#allocation9 + $0x3e0] sm:$0xff]  }
  0x78   :  { %3569 = vmatpush3.bf16.msra.mxu0 %v4194_v0  ;;  %v4254_v0 = vld [vmem:[#allocation9 + $0x320] sm:$0xff]  }
  0x79   :  { %3591 = vmatpush3.bf16.msra.mxu1 %v4195_v1  ;;  %3570 = vmatprep.subr.bf16.mxu0 %v4196_v2  ;;  %v4255_v1 = vld [vmem:[#allocation9 + $0x3a0] sm:$0xff]   ;;  %v4256_v2 = vld [vmem:[#allocation9 + $0x358] sm:$0xff]  }
  0x7a   :  { %3592 = vmatprep.subr.bf16.mxu1 %v4197_v3  ;;  %v4257_v3 = vld [vmem:[#allocation9 + $0x3d8] sm:$0xff]  }
  0x7c   :  { %3571 = vmatpush3.bf16.msra.mxu0 %v4198_v4  ;;  %v4258_v4 = vld [vmem:[#allocation9 + $0x318] sm:$0xff]  }
  0x7d   :  { %3593 = vmatpush3.bf16.msra.mxu1 %v4199_v5  ;;  %3600 = vmatprep.subr.bf16.mxu0 %v4204_v12  ;;  %v4259_v5 = vld [vmem:[#allocation9 + $0x398] sm:$0xff]   ;;  %v4266_v12 = vld [vmem:[#allocation9 + $0x308] sm:$0xff]  }
  0x7e   :  { %3622 = vmatprep.subr.bf16.mxu1 %v4205_v13  ;;  %v4267_v13 = vld [vmem:[#allocation9 + $0x388] sm:$0xff]  }
  0x7f   :  { %1857 = vmatmul.mubr.bf16.vlgmr.msra.gmra.mxu0 %v3270_v7  ;;  %v4261_v7 = vld [vmem:[#allocation9 + $0x3d0] sm:$0xff]  }
  0x80   :  { %1897 = vmatmul.mubr.bf16.vlgmr.msra.gmra.mxu1 %v3272_v10  ;;  %3601 = vmatpush3.bf16.msra.mxu0 %v4206_v14  ;;  %v4264_v10 = vld [vmem:[#allocation9 + $0x348] sm:$0xff]   ;;  %v4268_v14 = vld [vmem:[#allocation9 + $0x340] sm:$0xff]  }
  0x81   :  { %3623 = vmatpush3.bf16.msra.mxu1 %v4207_v15  ;;  %3602 = vmatprep.subr.bf16.mxu0 %v4208_v16  ;;  %v4269_v15 = vld [vmem:[#allocation9 + $0x3c0] sm:$0xff]  }
  0x82   :  { %3624 = vmatprep.subr.bf16.mxu1 %v4209_v17  ;;  %1936 = vmatprep.mubr.bf16.mxu0 %v3275_v47  ;;  %v4270_v16 = vld [vmem:[#allocation9 + $0x300] sm:$0xff]   ;;  %v4299_v47 = vld [vmem:[#allocation9 + $0x490] sm:$0xff]  }
  0x83   :  { %1976 = vmatprep.mubr.bf16.mxu1 %v3277_v49  ;;  %v4271_v17 = vld [vmem:[#allocation9 + $0x380] sm:$0xff]   ;;  %v4301_v49 = vld [vmem:[#allocation9 + $0x4c8] sm:$0xff]  }
  0x84   :  { %3603 = vmatpush3.bf16.msra.mxu0 %v4210_v18  ;;  %v118_v18 = vld [vmem:[#allocation8 + $0x30] sm:$0xff] }
  0x85   :  { %3625 = vmatpush3.bf16.msra.mxu1 %v4211_v19  ;;  %3604 = vmatprep.subr.bf16.mxu0 %v4212_v20  ;;  %v119_v19 = vld [vmem:[#allocation8 + $0x38] sm:$0xff]  ;;  %v3278_v20 = vcombine.low %v118_v18, %v118_v18 }
  0x86   :  { %3626 = vmatprep.subr.bf16.mxu1 %v4213_v21  ;;  %v3279_v21 = vcombine.high %v118_v18, %v118_v18  ;;  %v4332_v18 = vld [vmem:[#allocation9 + $0x550] sm:$0xff]  }
  0x88   :  { %3605 = vmatpush3.bf16.msra.mxu0 %v4214_v22  ;;  %v3280_v22 = vcombine.low %v119_v19, %v119_v19 }
  0x89   :  { %3627 = vmatpush3.bf16.msra.mxu1 %v4215_v23  ;;  %3606 = vmatprep.subr.bf16.mxu0 %v4216_v24  ;;  %v4276_v23 = vld [vmem:[#allocation9 + $0x478] sm:$0xff]   ;;  %v3281_v24 = vcombine.high %v119_v19, %v119_v19  ;;  %v4333_v19 = vld [vmem:[#allocation9 + $0x5d0] sm:$0xff]  }
  0x8a   :  { %3628 = vmatprep.subr.bf16.mxu1 %v4217_v25  ;;  %v4277_v25 = vld [vmem:[#allocation9 + $0x4f8] sm:$0xff]  }
  0x8c   :  { %3607 = vmatpush3.bf16.msra.mxu0 %v4218_v26  ;;  %v4278_v26 = vld [vmem:[#allocation9 + $0x438] sm:$0xff]  }
  0x8d   :  { %3629 = vmatpush3.bf16.msra.mxu1 %v4219_v27  ;;  %3608 = vmatprep.subr.bf16.mxu0 %v4220_v28  ;;  %v4279_v27 = vld [vmem:[#allocation9 + $0x4b8] sm:$0xff]   ;;  %v4280_v28 = vld [vmem:[#allocation9 + $0x470] sm:$0xff]  }
  0x8e   :  { %3630 = vmatprep.subr.bf16.mxu1 %v4221_v29  ;;  %v4281_v29 = vld [vmem:[#allocation9 + $0x4f0] sm:$0xff]  }
  0x90   :  { %3609 = vmatpush3.bf16.msra.mxu0 %v4222_v30  ;;  %v4282_v30 = vld [vmem:[#allocation9 + $0x430] sm:$0xff]  }
  0x91   :  { %3631 = vmatpush3.bf16.msra.mxu1 %v4223_v31  ;;  %3610 = vmatprep.subr.bf16.mxu0 %v4224_v32  ;;  %v4283_v31 = vld [vmem:[#allocation9 + $0x4b0] sm:$0xff]   ;;  %v4284_v32 = vld [vmem:[#allocation9 + $0x468] sm:$0xff]  }
  0x92   :  { %3632 = vmatprep.subr.bf16.mxu1 %v4225_v33  ;;  %v4285_v33 = vld [vmem:[#allocation9 + $0x4e8] sm:$0xff]  }
  0x94   :  { %3611 = vmatpush3.bf16.msra.mxu0 %v4226_v34  ;;  %v4286_v34 = vld [vmem:[#allocation9 + $0x428] sm:$0xff]  }
  0x95   :  { %3633 = vmatpush3.bf16.msra.mxu1 %v4227_v35  ;;  %3612 = vmatprep.subr.bf16.mxu0 %v4228_v36  ;;  %v4287_v35 = vld [vmem:[#allocation9 + $0x4a8] sm:$0xff]   ;;  %v4288_v36 = vld [vmem:[#allocation9 + $0x460] sm:$0xff]  }
  0x96   :  { %3634 = vmatprep.subr.bf16.mxu1 %v4229_v37  ;;  %v4289_v37 = vld [vmem:[#allocation9 + $0x4e0] sm:$0xff]  }
  0x98   :  { %3613 = vmatpush3.bf16.msra.mxu0 %v4230_v38  ;;  %v4290_v38 = vld [vmem:[#allocation9 + $0x420] sm:$0xff]  }
  0x99   :  { %3635 = vmatpush3.bf16.msra.mxu1 %v4231_v39  ;;  %3614 = vmatprep.subr.bf16.mxu0 %v4232_v40  ;;  %v4291_v39 = vld [vmem:[#allocation9 + $0x4a0] sm:$0xff]   ;;  %v4292_v40 = vld [vmem:[#allocation9 + $0x458] sm:$0xff]  }
  0x9a   :  { %3636 = vmatprep.subr.bf16.mxu1 %v4233_v41  ;;  %v4293_v41 = vld [vmem:[#allocation9 + $0x4d8] sm:$0xff]  }
  0x9c   :  { %3615 = vmatpush3.bf16.msra.mxu0 %v4234_v42  ;;  %v4294_v42 = vld [vmem:[#allocation9 + $0x418] sm:$0xff]  }
  0x9d   :  { %3637 = vmatpush3.bf16.msra.mxu1 %v4235_v43  ;;  %3644 = vmatprep.subr.bf16.mxu0 %v4240_v50  ;;  %v4295_v43 = vld [vmem:[#allocation9 + $0x498] sm:$0xff]   ;;  %v4302_v50 = vld [vmem:[#allocation9 + $0x408] sm:$0xff]  }
  0x9e   :  { %3666 = vmatprep.subr.bf16.mxu1 %v4241_v51  ;;  %v4303_v51 = vld [vmem:[#allocation9 + $0x488] sm:$0xff]  }
  0x9f   :  { %1937 = vmatmul.mubr.bf16.vlgmr.msra.gmra.mxu0 %v3274_v46  ;;  %v4298_v46 = vld [vmem:[#allocation9 + $0x410] sm:$0xff]  }
  0xa0   :  { %1977 = vmatmul.mubr.bf16.vlgmr.msra.gmra.mxu1 %v3276_v48  ;;  %3645 = vmatpush3.bf16.msra.mxu0 %v4242_v52  ;;  %v4300_v48 = vld [vmem:[#allocation9 + $0x448] sm:$0xff]   ;;  %v4304_v52 = vld [vmem:[#allocation9 + $0x440] sm:$0xff]  }
  0xa1   :  { %3667 = vmatpush3.bf16.msra.mxu1 %v4243_v53  ;;  %3646 = vmatprep.subr.bf16.mxu0 %v4244_v54  ;;  %v4305_v53 = vld [vmem:[#allocation9 + $0x4c0] sm:$0xff]  }
  0xa2   :  { %3668 = vmatprep.subr.bf16.mxu1 %v4245_v55  ;;  %2016 = vmatprep.mubr.bf16.mxu0 %v3279_v21  ;;  %v4306_v54 = vld [vmem:[#allocation9 + $0x400] sm:$0xff]   ;;  %v4335_v21 = vld [vmem:[#allocation9 + $0x590] sm:$0xff]  }
  0xa3   :  { %2056 = vmatprep.mubr.bf16.mxu1 %v3281_v24  ;;  %v4307_v55 = vld [vmem:[#allocation9 + $0x480] sm:$0xff]   ;;  %v4338_v24 = vld [vmem:[#allocation9 + $0x508] sm:$0xff]  }
  0xa4   :  { %3647 = vmatpush3.bf16.msra.mxu0 %v4246_v56  ;;  %v120_v56 = vld [vmem:[#allocation8 + $0x40] sm:$0xff] }
  0xa5   :  { %3669 = vmatpush3.bf16.msra.mxu1 %v4247_v57  ;;  %3648 = vmatprep.subr.bf16.mxu0 %v4248_v58  ;;  %v3282_v57 = vcombine.low %v120_v56, %v120_v56  ;;  %v3283_v58 = vcombine.high %v120_v56, %v120_v56 }
  0xa6   :  { %3670 = vmatprep.subr.bf16.mxu1 %v4249_v59  ;;  %v121_v59 = vld [vmem:[#allocation8 + $0x48] sm:$0xff] }
  0xa8   :  { %3649 = vmatpush3.bf16.msra.mxu0 %v4250_v60  ;;  %v3284_v60 = vcombine.low %v121_v59, %v121_v59 }
  0xa9   :  { %3671 = vmatpush3.bf16.msra.mxu1 %v4251_v61  ;;  %3650 = vmatprep.subr.bf16.mxu0 %v4252_v62  ;;  %v3285_v61 = vcombine.high %v121_v59, %v121_v59  ;;  %v4312_v62 = vld [vmem:[#allocation9 + $0x578] sm:$0xff]  }
  0xaa   :  { %3672 = vmatprep.subr.bf16.mxu1 %v4253_v63  ;;  %v4313_v63 = vld [vmem:[#allocation9 + $0x5f8] sm:$0xff]  }
  0xac   :  { %3651 = vmatpush3.bf16.msra.mxu0 %v4254_v0  ;;  %v4314_v0 = vld [vmem:[#allocation9 + $0x538] sm:$0xff]  }
  0xad   :  { %3673 = vmatpush3.bf16.msra.mxu1 %v4255_v1  ;;  %3652 = vmatprep.subr.bf16.mxu0 %v4256_v2  ;;  %v4315_v1 = vld [vmem:[#allocation9 + $0x5b8] sm:$0xff]   ;;  %v4316_v2 = vld [vmem:[#allocation9 + $0x570] sm:$0xff]  }
  0xae   :  { %3674 = vmatprep.subr.bf16.mxu1 %v4257_v3  ;;  %v4317_v3 = vld [vmem:[#allocation9 + $0x5f0] sm:$0xff]  }
  0xb0   :  { %3653 = vmatpush3.bf16.msra.mxu0 %v4258_v4  ;;  %v4318_v4 = vld [vmem:[#allocation9 + $0x530] sm:$0xff]  }
  0xb1   :  { %3675 = vmatpush3.bf16.msra.mxu1 %v4259_v5  ;;  %3654 = vmatprep.subr.bf16.mxu0 %v4260_v6  ;;  %v4319_v5 = vld [vmem:[#allocation9 + $0x5b0] sm:$0xff]   ;;  %v4320_v6 = vld [vmem:[#allocation9 + $0x568] sm:$0xff]  }
  0xb2   :  { %3676 = vmatprep.subr.bf16.mxu1 %v4261_v7  ;;  %v4321_v7 = vld [vmem:[#allocation9 + $0x5e8] sm:$0xff]  }
  0xb4   :  { %3655 = vmatpush3.bf16.msra.mxu0 %v4262_v8  ;;  %v4322_v8 = vld [vmem:[#allocation9 + $0x528] sm:$0xff]  }
  0xb5   :  { %3677 = vmatpush3.bf16.msra.mxu1 %v4263_v9  ;;  %3656 = vmatprep.subr.bf16.mxu0 %v4264_v10  ;;  %v4323_v9 = vld [vmem:[#allocation9 + $0x5a8] sm:$0xff]   ;;  %v4324_v10 = vld [vmem:[#allocation9 + $0x560] sm:$0xff]  }
  0xb6   :  { %3678 = vmatprep.subr.bf16.mxu1 %v4265_v11  ;;  %v4325_v11 = vld [vmem:[#allocation9 + $0x5e0] sm:$0xff]  }
  0xb8   :  { %3657 = vmatpush3.bf16.msra.mxu0 %v4266_v12  ;;  %v4326_v12 = vld [vmem:[#allocation9 + $0x520] sm:$0xff]  }
  0xb9   :  { %3679 = vmatpush3.bf16.msra.mxu1 %v4267_v13  ;;  %3658 = vmatprep.subr.bf16.mxu0 %v4268_v14  ;;  %v4327_v13 = vld [vmem:[#allocation9 + $0x5a0] sm:$0xff]   ;;  %v4328_v14 = vld [vmem:[#allocation9 + $0x558] sm:$0xff]  }
  0xba   :  { %3680 = vmatprep.subr.bf16.mxu1 %v4269_v15  ;;  %v4329_v15 = vld [vmem:[#allocation9 + $0x5d8] sm:$0xff]  }
  0xbc   :  { %3659 = vmatpush3.bf16.msra.mxu0 %v4270_v16  ;;  %v4330_v16 = vld [vmem:[#allocation9 + $0x518] sm:$0xff]  }
  0xbd   :  { %3681 = vmatpush3.bf16.msra.mxu1 %v4271_v17  ;;  %3688 = vmatprep.subr.bf16.mxu0 %v4276_v23  ;;  %v4331_v17 = vld [vmem:[#allocation9 + $0x598] sm:$0xff]   ;;  %v4337_v23 = vld [vmem:[#allocation9 + $0x5c8] sm:$0xff]  }
  0xbe   :  { %3710 = vmatprep.subr.bf16.mxu1 %v4277_v25  ;;  %v4339_v25 = vld [vmem:[#allocation9 + $0x588] sm:$0xff]  }
  0xbf   :  { %2017 = vmatmul.mubr.bf16.vlgmr.msra.gmra.mxu0 %v3278_v20  ;;  %v4334_v20 = vld [vmem:[#allocation9 + $0x510] sm:$0xff]  }
  0xc0   :  { %2057 = vmatmul.mubr.bf16.vlgmr.msra.gmra.mxu1 %v3280_v22  ;;  %3689 = vmatpush3.bf16.msra.mxu0 %v4278_v26  ;;  %v4336_v22 = vld [vmem:[#allocation9 + $0x548] sm:$0xff]   ;;  %v4340_v26 = vld [vmem:[#allocation9 + $0x540] sm:$0xff]  }
  0xc1   :  { %3711 = vmatpush3.bf16.msra.mxu1 %v4279_v27  ;;  %3690 = vmatprep.subr.bf16.mxu0 %v4280_v28  ;;  %v4341_v27 = vld [vmem:[#allocation9 + $0x5c0] sm:$0xff]  }
  0xc2   :  { %3712 = vmatprep.subr.bf16.mxu1 %v4281_v29  ;;  %2096 = vmatprep.mubr.bf16.mxu0 %v3283_v58  ;;  %v4342_v28 = vld [vmem:[#allocation9 + $0x500] sm:$0xff]  }
  0xc3   :  { %2136 = vmatprep.mubr.bf16.mxu1 %v3285_v61  ;;  %v4343_v29 = vld [vmem:[#allocation9 + $0x580] sm:$0xff]  }
  0xc4   :  { %3691 = vmatpush3.bf16.msra.mxu0 %v4282_v30  ;;  %v122_v30 = vld [vmem:[#allocation8 + $0x50] sm:$0xff] }
  0xc5   :  { %3713 = vmatpush3.bf16.msra.mxu1 %v4283_v31  ;;  %3692 = vmatprep.subr.bf16.mxu0 %v4284_v32  ;;  %v123_v31 = vld [vmem:[#allocation8 + $0x58] sm:$0xff]  ;;  %v3286_v32 = vcombine.low %v122_v30, %v122_v30 }
  0xc6   :  { %3714 = vmatprep.subr.bf16.mxu1 %v4285_v33  ;;  %v3287_v33 = vcombine.high %v122_v30, %v122_v30 }
  0xc8   :  { %3693 = vmatpush3.bf16.msra.mxu0 %v4286_v34  ;;  %v3288_v34 = vcombine.low %v123_v31, %v123_v31 }
  0xc9   :  { %3715 = vmatpush3.bf16.msra.mxu1 %v4287_v35  ;;  %3694 = vmatprep.subr.bf16.mxu0 %v4288_v36  ;;  %v3289_v35 = vcombine.high %v123_v31, %v123_v31  ;;  %v2240_v36 = vld [vmem:[%s4895_s1] sm:$0xff] }
  0xca   :  { %3716 = vmatprep.subr.bf16.mxu1 %v4289_v37  ;;  %v4517_v37 = vmov 0.0  }
  0xcc   :  { %3695 = vmatpush3.bf16.msra.mxu0 %v4290_v38  ;;  %v2239_v38 = vld [vmem:[%s4894_s0] sm:$0x1] }
  0xcd   :  { %3717 = vmatpush3.bf16.msra.mxu1 %v4291_v39  ;;  %3696 = vmatprep.subr.bf16.mxu0 %v4292_v40 }
  0xce   :  { %3718 = vmatprep.subr.bf16.mxu1 %v4293_v41 }
  0xd0   :  { %3697 = vmatpush3.bf16.msra.mxu0 %v4294_v42 }
  0xd1   :  { %3719 = vmatpush3.bf16.msra.mxu1 %v4295_v43  ;;  %3698 = vmatprep.subr.bf16.mxu0 %v4296_v44 }
  0xd2   :  { %3720 = vmatprep.subr.bf16.mxu1 %v4297_v45 }
  0xd4   :  { %3699 = vmatpush3.bf16.msra.mxu0 %v4298_v46 }
  0xd5   :  { %3721 = vmatpush3.bf16.msra.mxu1 %v4299_v47  ;;  %3700 = vmatprep.subr.bf16.mxu0 %v4300_v48 }
  0xd6   :  { %3722 = vmatprep.subr.bf16.mxu1 %v4301_v49 }
  0xd8   :  { %3701 = vmatpush3.bf16.msra.mxu0 %v4302_v50  ;;  %v2324_v50 = vld [vmem:[%s4897_s3 + $0x38] sm:$0xff] }
  0xd9   :  { %3723 = vmatpush3.bf16.msra.mxu1 %v4303_v51  ;;  %3702 = vmatprep.subr.bf16.mxu0 %v4304_v52 }
  0xda   :  { %3724 = vmatprep.subr.bf16.mxu1 %v4305_v53 }
  0xdc   :  { %3703 = vmatpush3.bf16.msra.mxu0 %v4306_v54 }
  0xdd   :  { %3725 = vmatpush3.bf16.msra.mxu1 %v4307_v55  ;;  %3732 = vmatprep.subr.bf16.mxu0 %v4312_v62  ;;  %v2323_v55 = vld [vmem:[%s4897_s3 + $0x30] sm:$0xff] }
  0xde   :  { %3754 = vmatprep.subr.bf16.mxu1 %v4313_v63 }
  0xdf   :  { %2097 = vmatmul.mubr.bf16.vlgmr.msra.gmra.mxu0 %v3282_v57 }
  0xe0   :  { %2137 = vmatmul.mubr.bf16.vlgmr.msra.gmra.mxu1 %v3284_v60  ;;  %3733 = vmatpush3.bf16.msra.mxu0 %v4314_v0  ;;  %v2322_v60 = vld [vmem:[%s4897_s3 + $0x28] sm:$0xff]  ;;  %v2321_v0 = vld [vmem:[%s4897_s3 + $0x20] sm:$0xff] }
  0xe1   :  { %3755 = vmatpush3.bf16.msra.mxu1 %v4315_v1  ;;  %3734 = vmatprep.subr.bf16.mxu0 %v4316_v2  ;;  %v2320_v2 = vld [vmem:[%s4897_s3 + $0x18] sm:$0xff] }
  0xe2   :  { %3756 = vmatprep.subr.bf16.mxu1 %v4317_v3  ;;  %2176 = vmatprep.mubr.bf16.mxu0 %v3287_v33  ;;  %v2319_v3 = vld [vmem:[%s4897_s3 + $0x10] sm:$0xff] }
  0xe3   :  { %2216 = vmatprep.mubr.bf16.mxu1 %v3289_v35 }
  0xe4   :  { %3735 = vmatpush3.bf16.msra.mxu0 %v4318_v4  ;;  %v2318_v4 = vld [vmem:[%s4897_s3 + $0x8] sm:$0xff] }
  0xe5   :  { %3757 = vmatpush3.bf16.msra.mxu1 %v4319_v5  ;;  %3736 = vmatprep.subr.bf16.mxu0 %v4320_v6  ;;  %v2317_v5 = vld [vmem:[%s4897_s3] sm:$0xff] }
  0xe6   :  { %3758 = vmatprep.subr.bf16.mxu1 %v4321_v7 }
  0xe8   :  { %3737 = vmatpush3.bf16.msra.mxu0 %v4322_v8 }
  0xe9   :  { %3759 = vmatpush3.bf16.msra.mxu1 %v4323_v9  ;;  %3738 = vmatprep.subr.bf16.mxu0 %v4324_v10 }
  0xea   :  { %3760 = vmatprep.subr.bf16.mxu1 %v4325_v11 }
  0xec   :  { %3739 = vmatpush3.bf16.msra.mxu0 %v4326_v12 }
  0xed   :  { %3761 = vmatpush3.bf16.msra.mxu1 %v4327_v13  ;;  %3740 = vmatprep.subr.bf16.mxu0 %v4328_v14 }
  0xee   :  { %3762 = vmatprep.subr.bf16.mxu1 %v4329_v15 }
  0xf0   :  { %3741 = vmatpush3.bf16.msra.mxu0 %v4330_v16 }
  0xf1   :  { %3763 = vmatpush3.bf16.msra.mxu1 %v4331_v17  ;;  %3742 = vmatprep.subr.bf16.mxu0 %v4332_v18 }
  0xf2   :  { %3764 = vmatprep.subr.bf16.mxu1 %v4333_v19 }
  0xf4   :  { %3743 = vmatpush3.bf16.msra.mxu0 %v4334_v20 }
  0xf5   :  { %3765 = vmatpush3.bf16.msra.mxu1 %v4335_v21  ;;  %3744 = vmatprep.subr.bf16.mxu0 %v4336_v22 }
  0xf6   :  { %3766 = vmatprep.subr.bf16.mxu1 %v4337_v23 }
  0xf8   :  { %3745 = vmatpush3.bf16.msra.mxu0 %v4338_v24 }
  0xf9   :  { %3767 = vmatpush3.bf16.msra.mxu1 %v4339_v25  ;;  %3746 = vmatprep.subr.bf16.mxu0 %v4340_v26 }
  0xfa   :  { %3768 = vmatprep.subr.bf16.mxu1 %v4341_v27 }
  0xfc   :  { %3747 = vmatpush3.bf16.msra.mxu0 %v4342_v28 }
  0xfd   :  { %3769 = vmatpush3.bf16.msra.mxu1 %v4343_v29  ;;  %3920 = vmatprep.subr.mxu0 %v4517_v37 }
  0xfe   :  { %3886 = vmatprep.subr.mxu1 %v4517_v37 }
  0xff   :  { %2177 = vmatmul.mubr.bf16.vlgmr.msra.gmra.mxu0 %v3286_v32 }
 0x100   :  { %2217 = vmatmul.mubr.bf16.vlgmr.msra.gmra.mxu1 %v3288_v34  ;;  %3952 = vmatprep.mubr.msk.f32.mxu0 %vm4518_vm1, %v4517_v37 }
 0x101   :  { %3887 = vmatpush3.msra.mxu1 %v2240_v36  ;;  %3888 = vmatprep.mubr.msk.f32.mxu1 %vm4518_vm1, %v4517_v37 }
 0x102   :  { %3891 = vmatprep.subr.mxu1 %v4517_v37 }
 0x108   :  { %3889 = vmatmul.mubr.msk.f32.vlgmr.msra.gmra.mxu1 %vm2242_vm0, %v2239_v38 }
 0x109   :  { %3907 = vmatprep.mubr.msk.f32.mxu1 %vm4518_vm1, %v4517_v37  ;;  %3892 = vmatpush3.msra.mxu1 %v2324_v50 }
 0x10a   :  { %3893 = vmatprep.subr.mxu1 %v4517_v37 }
 0x10b   :  { %3894 = vmatpush3.msra.mxu1 %v2323_v55  ;;  %v2241_v55 = vld [vmem:[%s4896_s2] sm:$0x1] }
 0x10c   :  { %3895 = vmatprep.subr.mxu1 %v4517_v37 }
 0x10d   :  { %3896 = vmatpush3.msra.mxu1 %v2322_v60  ;;  %v2325_v60 = vld [vmem:[%s4898_s4] sm:$0x1] }
 0x10e   :  { %3897 = vmatprep.subr.mxu1 %v4517_v37 }
 0x10f   :  { %3898 = vmatpush3.msra.mxu1 %v2321_v0 }
 0x110   :  { %3899 = vmatprep.subr.mxu1 %v4517_v37 }
 0x111   :  { %3900 = vmatpush3.msra.mxu1 %v2320_v2 }
 0x112   :  { %3901 = vmatprep.subr.mxu1 %v4517_v37 }
 0x113   :  { %3902 = vmatpush3.msra.mxu1 %v2319_v3 }
 0x114   :  { %3903 = vmatprep.subr.mxu1 %v4517_v37 }
 0x115   :  { %3904 = vmatpush3.msra.mxu1 %v2318_v4 }
 0x116   :  { %3905 = vmatprep.subr.mxu1 %v4517_v37 }
 0x117   :  { %3906 = vmatpush3.msra.mxu1 %v2317_v5 }
 0x118   :  { %3910 = vmatprep.subr.mxu1 %v4517_v37 }
 0x11f   :  { %v3528_v39 = vpop.f32.mrf.mxu0 }
 0x120   :  { %v3550_v40 = vpop.f32.mrf.mxu1 }
 0x121   :  { %v3529_v41 = vpop.f32.mrf.mxu0 }
 0x122   :  { %v3551_v42 = vpop.f32.mrf.mxu1  ;;  %v3530_v43 = vadd.f32 %v3529_v41, %v3528_v39 }
 0x123   :  { %v3552_v44 = vadd.f32 %v3551_v42, %v3550_v40  ;;  %v3531_v46 = vpop.f32.mrf.mxu0 }
 0x124   :  { %v3553_v45 = vpop.f32.mrf.mxu1 }
 0x125   :  { %v1819_v47 = vadd.f32 %v3552_v44, %v3530_v43  ;;  %v3532_v49 = vpop.f32.mrf.mxu0 }
 0x126   :  { %v3554_v48 = vpop.f32.mrf.mxu1 }
 0x13f   :  { %v3572_v51 = vpop.f32.mrf.mxu0 }
 0x140   :  { %v3594_v52 = vpop.f32.mrf.mxu1 }
 0x141   :  { %v3573_v53 = vpop.f32.mrf.mxu0 }
 0x142   :  { %v3595_v54 = vpop.f32.mrf.mxu1  ;;  %v3574_v56 = vadd.f32 %v3573_v53, %v3572_v51 }
 0x143   :  { %v3596_v57 = vadd.f32 %v3595_v54, %v3594_v52  ;;  %v3575_v59 = vpop.f32.mrf.mxu0 }
 0x144   :  { %v3597_v58 = vpop.f32.mrf.mxu1  ;;  %v1859_v61 = vadd.f32 %v3574_v56, %v1819_v47 }
 0x145   :  { %v3576_v63 = vpop.f32.mrf.mxu0 }
 0x146   :  { %v3598_v62 = vpop.f32.mrf.mxu1  ;;  %v1899_v1 = vadd.f32 %v3596_v57, %v1859_v61 }
 0x15f   :  { %v3616_v6 = vpop.f32.mrf.mxu0 }
 0x160   :  { %v3638_v7 = vpop.f32.mrf.mxu1 }
 0x161   :  { %v3617_v8 = vpop.f32.mrf.mxu0 }
 0x162   :  { %v3618_v9 = vadd.f32 %v3617_v8, %v3616_v6  ;;  %v3639_v10 = vpop.f32.mrf.mxu1  ;;  %v2412_v6 = vld [vmem:[%s4899_s5] sm:$0xf]  ;;  %v4675_v8 = vld [vmem:[#allocation3 + $0x70] sm:$0xff] }
 0x163   :  { %v3640_v11 = vadd.f32 %v3639_v10, %v3638_v7  ;;  %v3619_v12 = vpop.f32.mrf.mxu0  ;;  %v4673_v7 = vld [vmem:[#allocation3 + $0x78] sm:$0xff]  ;;  %v4683_v10 = vld [vmem:[#allocation3 + $0x60] sm:$0xff] }
 0x164   :  { %v1939_v13 = vadd.f32 %v3618_v9, %v1899_v1  ;;  %v3641_v14 = vpop.f32.mrf.mxu1  ;;  %3921 = vmatpush3.msra.mxu0 %v4673_v7  ;;  %v4679_v9 = vld [vmem:[#allocation3 + $0x68] sm:$0xff]  ;;  %v4691_v12 = vld [vmem:[#allocation3 + $0x50] sm:$0xff] }
 0x165   :  { %v3620_v15 = vpop.f32.mrf.mxu0  ;;  %3922 = vmatprep.subr.mxu0 %v4517_v37  ;;  %v4699_v14 = vld [vmem:[#allocation3 + $0x40] sm:$0xff] }
 0x166   :  { %v1979_v16 = vadd.f32 %v3640_v11, %v1939_v13  ;;  %v3642_v17 = vpop.f32.mrf.mxu1  ;;  %3923 = vmatpush3.msra.mxu0 %v4675_v8  ;;  %v4687_v11 = vld [vmem:[#allocation3 + $0x58] sm:$0xff]  ;;  %v4695_v13 = vld [vmem:[#allocation3 + $0x48] sm:$0xff] }
 0x167   :  { %3924 = vmatprep.subr.mxu0 %v4517_v37  ;;  %v4703_v15 = vld [vmem:[#allocation3 + $0x38] sm:$0xff]  ;;  %v4711_v17 = vld [vmem:[#allocation3 + $0x28] sm:$0xff] }
 0x168   :  { %3925 = vmatpush3.msra.mxu0 %v4679_v9 }
 0x169   :  { %3926 = vmatprep.subr.mxu0 %v4517_v37 }
 0x16a   :  { %3927 = vmatpush3.msra.mxu0 %v4683_v10 }
 0x16b   :  { %3928 = vmatprep.subr.mxu0 %v4517_v37 }
 0x16c   :  { %3929 = vmatpush3.msra.mxu0 %v4687_v11 }
 0x16d   :  { %3930 = vmatprep.subr.mxu0 %v4517_v37 }
 0x16e   :  { %3931 = vmatpush3.msra.mxu0 %v4691_v12 }
 0x16f   :  { %3932 = vmatprep.subr.mxu0 %v4517_v37 }
 0x170   :  { %3933 = vmatpush3.msra.mxu0 %v4695_v13 }
 0x171   :  { %3934 = vmatprep.subr.mxu0 %v4517_v37 }
 0x172   :  { %3935 = vmatpush3.msra.mxu0 %v4699_v14 }
 0x173   :  { %3936 = vmatprep.subr.mxu0 %v4517_v37 }
 0x174   :  { %3937 = vmatpush3.msra.mxu0 %v4703_v15 }
 0x175   :  { %3938 = vmatprep.subr.mxu0 %v4517_v37 }
 0x17f   :  { %v3660_v18 = vpop.f32.mrf.mxu0 }
 0x180   :  { %v3682_v19 = vpop.f32.mrf.mxu1 }
 0x181   :  { %v3661_v20 = vpop.f32.mrf.mxu0 }
 0x182   :  { %v3662_v21 = vadd.f32 %v3661_v20, %v3660_v18  ;;  %v3683_v22 = vpop.f32.mrf.mxu1  ;;  %v4715_v18 = vld [vmem:[#allocation3 + $0x20] sm:$0xff] }
 0x183   :  { %v3684_v23 = vadd.f32 %v3683_v22, %v3682_v19  ;;  %v3663_v24 = vpop.f32.mrf.mxu0  ;;  %v4719_v19 = vld [vmem:[#allocation3 + $0x18] sm:$0xff] }
 0x184   :  { %v2019_v25 = vadd.f32 %v3662_v21, %v1979_v16  ;;  %v3685_v26 = vpop.f32.mrf.mxu1  ;;  %v4707_v16 = vld [vmem:[#allocation3 + $0x30] sm:$0xff] }
 0x185   :  { %v3664_v27 = vpop.f32.mrf.mxu0  ;;  %3939 = vmatpush3.msra.mxu0 %v4707_v16  ;;  %v4734_v24 = vld [vmem:[#allocation3 + $0x10] sm:$0xff]  ;;  %v4742_v26 = vld [vmem:[#allocation3] sm:$0xff] }
 0x186   :  { %v2059_v28 = vadd.f32 %v3684_v23, %v2019_v25  ;;  %v3686_v29 = vpop.f32.mrf.mxu1  ;;  %3940 = vmatprep.subr.mxu0 %v4517_v37  ;;  %v2491_v23 = vld [vmem:[%s4901_s7] sm:$0xf]  ;;  %v4738_v25 = vld [vmem:[#allocation3 + $0x8] sm:$0xff]  ;;  %v4348_v27 = vld [vmem:[#allocation11 + $0x38] sm:$0xff]  }
 0x187   :  { %3941 = vmatpush3.msra.mxu0 %v4711_v17  ;;  %v4350_v29 = vld [vmem:[#allocation11 + $0x28] sm:$0xff]  }
 0x188   :  { %3942 = vmatprep.subr.mxu0 %v4517_v37 }
 0x189   :  { %3943 = vmatpush3.msra.mxu0 %v4715_v18 }
 0x18a   :  { %3944 = vmatprep.subr.mxu0 %v4517_v37 }
 0x18b   :  { %3945 = vmatpush3.msra.mxu0 %v4719_v19 }
 0x18c   :  { %3946 = vmatprep.subr.mxu0 %v4517_v37 }
 0x18d   :  { %3947 = vmatpush3.msra.mxu0 %v4734_v24 }
 0x18e   :  { %3948 = vmatprep.subr.mxu0 %v4517_v37 }
 0x18f   :  { %3949 = vmatpush3.msra.mxu0 %v4738_v25 }
 0x190   :  { %3950 = vmatprep.subr.mxu0 %v4517_v37 }
 0x191   :  { %3951 = vmatpush3.msra.mxu0 %v4742_v26 }
 0x192   :  { %3975 = vmatprep.subr.mxu0 %v4517_v37 }
 0x19f   :  { %v3704_v30 = vpop.f32.mrf.mxu0 }
 0x1a0   :  { %v3726_v31 = vpop.f32.mrf.mxu1 }
 0x1a1   :  { %v3705_v32 = vpop.f32.mrf.mxu0 }
 0x1a2   :  { %v3727_v33 = vpop.f32.mrf.mxu1  ;;  %v3706_v34 = vadd.f32 %v3705_v32, %v3704_v30  ;;  %v4351_v30 = vld [vmem:[#allocation11 + $0x20] sm:$0xff]   ;;  %v4353_v32 = vld [vmem:[#allocation11 + $0x10] sm:$0xff]  }
 0x1a3   :  { %v3728_v35 = vadd.f32 %v3727_v33, %v3726_v31  ;;  %v3707_v38 = vpop.f32.mrf.mxu0  ;;  %v4352_v31 = vld [vmem:[#allocation11 + $0x18] sm:$0xff]   ;;  %v4354_v33 = vld [vmem:[#allocation11 + $0x8] sm:$0xff]  }
 0x1a4   :  { %v3729_v36 = vpop.f32.mrf.mxu1  ;;  %v2099_v39 = vadd.f32 %v3706_v34, %v2059_v28  ;;  %v4349_v28 = vld [vmem:[#allocation11 + $0x30] sm:$0xff]   ;;  %v2566_v34 = vlaneseq }
 0x1a5   :  { %v3708_v41 = vpop.f32.mrf.mxu0 }
 0x1a6   :  { %v3730_v40 = vpop.f32.mrf.mxu1  ;;  %v2139_v42 = vadd.f32 %v3728_v35, %v2099_v39  ;;  %v2567_v35 = vshrl.u32 %v2566_v34, 7  ;;  %v4371_v34 = vld [vmem:[%s4906_s12] sm:$0xff]  }
 0x1a8   :  { %v2568_v36 = vsub.s32 0, %v2567_v35  ;;  %v3177_v35 = vld [vmem:[#allocation6 + $0x78] sm:$0xff] }
 0x1bf   :  { %v3748_v43 = vpop.f32.mrf.mxu0 }
 0x1c0   :  { %v3770_v44 = vpop.f32.mrf.mxu1 }
 0x1c1   :  { %v3749_v45 = vpop.f32.mrf.mxu0 }
 0x1c2   :  { %v3750_v46 = vadd.f32 %v3749_v45, %v3748_v43  ;;  %v3771_v47 = vpop.f32.mrf.mxu1  ;;  %v4355_v45 = vld [vmem:[#allocation11] sm:$0xff]  }
 0x1c3   :  { %v3772_v48 = vadd.f32 %v3771_v47, %v3770_v44  ;;  %v3751_v49 = vpop.f32.mrf.mxu0 }
 0x1c4   :  { %v2179_v50 = vadd.f32 %v3750_v46, %v2139_v42  ;;  %v3773_v51 = vpop.f32.mrf.mxu1 }
 0x1c5   :  { %v3752_v52 = vpop.f32.mrf.mxu0 }
 0x1c6   :  { %v4658_v53 = vadd.f32 %v3772_v48, %v2179_v50  ;;  %v3774_v54 = vpop.f32.mrf.mxu1 }
 0x1c8   :  { %v2312_v56 = vpop.f32.mrf.mxu1 }
 0x1c9   :  { %v2313_v57 = vadd.f32 %v2312_v56, %v2241_v55  ;;  %v4356_v55 = vld [vmem:[#allocation11 + $0x78] sm:$0xff]   ;;  %v4357_v56 = vld [vmem:[#allocation11 + $0x70] sm:$0xff]  }
 0x1ca   :  { %v3890_v58 = vpop.f32.mrf.mxu1 }
 0x1cb   :  { %v2316_v59 = vmax.f32 %v2313_v57, 0.0  ;;  %v4358_v57 = vld [vmem:[#allocation11 + $0x68] sm:$0xff]   ;;  %v4359_v58 = vld [vmem:[#allocation11 + $0x60] sm:$0xff]  }
 0x1cd   :  { %3908 = vmatmul.mubr.msk.f32.vlgmr.msra.gmra.mxu1 %vm2326_vm2, %v2316_v59  ;;  %v4360_v59 = vld [vmem:[#allocation11 + $0x58] sm:$0xff]  }
 0x1ce   :  { %3912 = vmatprep.mubr.msk.f32.mxu1 %vm4518_vm1, %v4517_v37  ;;  %3911 = vmatpush3.msk.msra.mxu1 %vm2417_vm4, %v2412_v6 }
 0x1cf   :  { %3915 = vmatprep.subr.mxu1 %v4517_v37 }
 0x28d   :  { %v2396_v61 = vpop.f32.mrf.mxu1 }
 0x28e   :  { %v2397_v62 = vadd.f32 %v2396_v61, %v2325_v60  ;;  %v4361_v60 = vld [vmem:[#allocation11 + $0x50] sm:$0xff]   ;;  %v4362_v61 = vld [vmem:[#allocation11 + $0x48] sm:$0xff]  }
 0x28f   :  { %v3909_v63 = vpop.f32.mrf.mxu1 }
 0x290   :  { %v2401_v0 = vsel %vm2400_vm3, %v2397_v62, -inf }
 0x291   :  { %2402 = vmax.xlane.f32.xlu0 %v2401_v0 }
 0x31a   :  { %v2403_v1 = vpop.xlane.xlu0 %2402 }
 0x31b   :  { %v2404_v2 = vsub.f32 %v2397_v62, %v2403_v1  ;;  %v4363_v62 = vld [vmem:[#allocation11 + $0x40] sm:$0xff]  }
 0x31d   :  { %v2405_v3 = vmul.f32 1.442695, %v2404_v2 }
 0x31f   :  { %4372 = vpow2.f32 %v2405_v3 }
 0x32c   :  { %v4373_v4 = vpop.eup %4372 }
 0x32d   :  { %v2407_v5 = vsel %vm2400_vm3, %v4373_v4, 0.0 }
 0x32e   :  { %2408 = vadd.xlane.f32.xlu0 %v2407_v5 }
 0x3b7   :  { %v2409_v20 = vpop.xlane.xlu0 %2408 }
 0x3b8   :  { %4374 = vrcp.f32 %v2409_v20 }
 0x3c5   :  { %v4375_v21 = vpop.eup %4374 }
 0x3c6   :  { %v2411_v22 = vmul.f32 %v4375_v21, %v4373_v4 }
 0x3c8   :  { %3913 = vmatmul.mubr.msk.f32.vlgmr.msra.gmra.mxu1 %vm2413_vm5, %v2411_v22 }
 0x3c9   :  { %3916 = vmatpush3.msk.msra.mxu1 %vm2417_vm4, %v2491_v23  ;;  %3917 = vmatprep.mubr.msk.f32.mxu1 %vm4518_vm1, %v4517_v37 }
 0x3ca   :  { %3955 = vmatprep.subr.bf16.mxu1 %v4517_v37 }
 0x3cc   :  { %3918 = vmatmul.mubr.msk.f32.vlgmr.msra.gmra.mxu1 %vm2413_vm5, %v2411_v22 }
 0x3cd   :  { %3971 = vmatprep.mubr.msk.bf16.mxu1 %vm4518_vm1, %v4517_v37  ;;  %3956 = vmatpush3.bf16.msra.mxu1 %v4348_v27  ;;  %v4364_v27 = vld [vmem:[%s4906_s12 + $0x38] sm:$0xff]  }
 0x3ce   :  { %3957 = vmatprep.subr.bf16.mxu1 %v4517_v37 }
 0x3d1   :  { %3958 = vmatpush3.bf16.msra.mxu1 %v4349_v28  ;;  %v4365_v28 = vld [vmem:[%s4906_s12 + $0x30] sm:$0xff]  }
 0x3d2   :  { %3959 = vmatprep.subr.bf16.mxu1 %v4517_v37 }
 0x3d5   :  { %3960 = vmatpush3.bf16.msra.mxu1 %v4350_v29  ;;  %v4366_v29 = vld [vmem:[%s4906_s12 + $0x28] sm:$0xff]  }
 0x3d6   :  { %3961 = vmatprep.subr.bf16.mxu1 %v4517_v37 }
 0x3d9   :  { %3962 = vmatpush3.bf16.msra.mxu1 %v4351_v30  ;;  %v4367_v30 = vld [vmem:[%s4906_s12 + $0x20] sm:$0xff]  }
 0x3da   :  { %3963 = vmatprep.subr.bf16.mxu1 %v4517_v37 }
 0x3dd   :  { %3964 = vmatpush3.bf16.msra.mxu1 %v4352_v31  ;;  %v4368_v31 = vld [vmem:[%s4906_s12 + $0x18] sm:$0xff]  }
 0x3de   :  { %3965 = vmatprep.subr.bf16.mxu1 %v4517_v37 }
 0x3e1   :  { %3966 = vmatpush3.bf16.msra.mxu1 %v4353_v32  ;;  %v4369_v32 = vld [vmem:[%s4906_s12 + $0x10] sm:$0xff]  }
 0x3e2   :  { %3967 = vmatprep.subr.bf16.mxu1 %v4517_v37 }
 0x3e5   :  { %3968 = vmatpush3.bf16.msra.mxu1 %v4354_v33  ;;  %v4370_v33 = vld [vmem:[%s4906_s12 + $0x8] sm:$0xff]   ;;  %s4519_s12 = smov [#allocation12]  }
 0x3e6   :  { %3969 = vmatprep.subr.bf16.mxu1 %v4517_v37  ;;  %s3255_s27 = sshll.u32 %s4519_s12, 4  ;;  %s3256_s27 = int_to_ptr.vmem [resolvable:$true] %s3255_s27 }
 0x3e7   :  { %s4480_s29 = scalar_lea.vmem %s3256_s27, 128  ;;  %p4485_p12 = scmp.lt.s32.totalorder %s3256_s27, %s3256_s27 }
 0x3e8   :  { %p4481_p11 = scmp.ne.s32.totalorder %s3256_s27, %s4480_s29  ;;  %p4486_p13 = scmp.lt.s32.totalorder %s4480_s29, %s4480_s29 }
 0x3e9   :  { %3970 = vmatpush3.bf16.msra.mxu1 %v4355_v45  ;;  %v3169_v45 = vld [vmem:[#allocation6 + $0x38] sm:$0xff] }
 0x3ea   :  { %4010 = vmatprep.subr.bf16.mxu1 %v4517_v37  ;;  %p4487_p0 = por %p4486_p13, %p4485_p12 }
 0x3ec   :  { %p4488_p1 = pnand %p4487_p0, %p4481_p11 }
 0x488   :  { %v2487_v38 = vpop.f32.mrf.mxu1 }
 0x489   :  { %v4753_v39 = vrot.slane %v2487_v38, %v2568_v36  ;;  %v3175_v38 = vld [vmem:[#allocation6 + $0x68] sm:$0xff] }
 0x48a   :  { %v3914_v40 = vpop.f32.mrf.mxu1 }
 0x48b   :  { %v2570_v41 = vmul.f32 %v4753_v39, %v4658_v53  ;;  %v3173_v40 = vld [vmem:[#allocation6 + $0x58] sm:$0xff] }
 0x48c   :  { %v2561_v42 = vpop.f32.mrf.mxu1 }
 0x48d   :  { %v4757_v43 = vrot.slane %v2561_v42, %v2568_v36  ;;  %3953 = vmatmul.mubr.f32.vlgmr.msra.gmra.mxu0 %v2570_v41  ;;  %v3176_v36 = vld [vmem:[#allocation6 + $0x70] sm:$0xff]  ;;  %v3171_v42 = vld [vmem:[#allocation6 + $0x48] sm:$0xff] }
 0x48e   :  { %v3919_v44 = vpop.f32.mrf.mxu1  ;;  %3976 = vmatpush3.msra.mxu0 %v4673_v7  ;;  %4007 = vmatprep.mubr.msk.f32.mxu0 %vm4518_vm1, %v4517_v37  ;;  %v3172_v41 = vld [vmem:[#allocation6 + $0x50] sm:$0xff] }
 0x48f   :  { %3977 = vmatprep.subr.mxu0 %v4517_v37  ;;  %v3170_v44 = vld [vmem:[#allocation6 + $0x40] sm:$0xff] }
 0x490   :  { %3978 = vmatpush3.msra.mxu0 %v4675_v8 }
 0x491   :  { %3979 = vmatprep.subr.mxu0 %v4517_v37 }
 0x492   :  { %3980 = vmatpush3.msra.mxu0 %v4679_v9 }
 0x493   :  { %3981 = vmatprep.subr.mxu0 %v4517_v37 }
 0x494   :  { %3982 = vmatpush3.msra.mxu0 %v4683_v10 }
 0x495   :  { %3983 = vmatprep.subr.mxu0 %v4517_v37 }
 0x496   :  { %3984 = vmatpush3.msra.mxu0 %v4687_v11 }
 0x497   :  { %3985 = vmatprep.subr.mxu0 %v4517_v37 }
 0x498   :  { %3986 = vmatpush3.msra.mxu0 %v4691_v12 }
 0x499   :  { %3987 = vmatprep.subr.mxu0 %v4517_v37 }
 0x49a   :  { %3988 = vmatpush3.msra.mxu0 %v4695_v13 }
 0x49b   :  { %3989 = vmatprep.subr.mxu0 %v4517_v37 }
 0x49c   :  { %3990 = vmatpush3.msra.mxu0 %v4699_v14 }
 0x49d   :  { %3991 = vmatprep.subr.mxu0 %v4517_v37 }
 0x49e   :  { %3992 = vmatpush3.msra.mxu0 %v4703_v15 }
 0x49f   :  { %3993 = vmatprep.subr.mxu0 %v4517_v37 }
 0x4a0   :  { %3994 = vmatpush3.msra.mxu0 %v4707_v16 }
 0x4a1   :  { %3995 = vmatprep.subr.mxu0 %v4517_v37 }
 0x4a2   :  { %3996 = vmatpush3.msra.mxu0 %v4711_v17 }
 0x4a3   :  { %3997 = vmatprep.subr.mxu0 %v4517_v37 }
 0x4a4   :  { %3998 = vmatpush3.msra.mxu0 %v4715_v18 }
 0x4a5   :  { %3999 = vmatprep.subr.mxu0 %v4517_v37 }
 0x4a6   :  { %4000 = vmatpush3.msra.mxu0 %v4719_v19 }
 0x4a7   :  { %4001 = vmatprep.subr.mxu0 %v4517_v37 }
 0x4a8   :  { %4002 = vmatpush3.msra.mxu0 %v4734_v24 }
 0x4a9   :  { %4003 = vmatprep.subr.mxu0 %v4517_v37 }
 0x4aa   :  { %4004 = vmatpush3.msra.mxu0 %v4738_v25 }
 0x4ab   :  { %4005 = vmatprep.subr.mxu0 %v4517_v37 }
 0x4ac   :  { %4006 = vmatpush3.msra.mxu0 %v4742_v26 }
 0x4ad   :  { %4030 = vmatprep.subr.mxu0 %v4517_v37 }
 0x54d   :  { %v2653_v46 = vpop.f32.mrf.mxu0 }
 0x54e   :  { %v2657_v47 = vmax.f32 %v2653_v46, 0.0  ;;  %v3168_v46 = vld [vmem:[#allocation6 + $0x30] sm:$0xff] }
 0x54f   :  { %v3954_v48 = vpop.f32.mrf.mxu0 }
 0x550   :  { %v2658_v49 = vpack.c.bf16 %v2657_v47, %v2657_v47  ;;  %v3167_v47 = vld [vmem:[#allocation6 + $0x28] sm:$0xff]  ;;  %v3166_v48 = vld [vmem:[#allocation6 + $0x20] sm:$0xff] }
 0x552   :  { %3972 = vmatmul.mubr.bf16.vlgmr.msra.gmra.mxu1 %v2658_v49  ;;  %v3165_v49 = vld [vmem:[#allocation6 + $0x18] sm:$0xff] }
 0x553   :  { %4026 = vmatprep.mubr.msk.bf16.mxu1 %vm4518_vm1, %v4517_v37  ;;  %4011 = vmatpush3.bf16.msra.mxu1 %v4356_v55 }
 0x554   :  { %4012 = vmatprep.subr.bf16.mxu1 %v4517_v37 }
 0x557   :  { %4013 = vmatpush3.bf16.msra.mxu1 %v4357_v56 }
 0x558   :  { %4014 = vmatprep.subr.bf16.mxu1 %v4517_v37 }
 0x55b   :  { %4015 = vmatpush3.bf16.msra.mxu1 %v4358_v57 }
 0x55c   :  { %4016 = vmatprep.subr.bf16.mxu1 %v4517_v37 }
 0x55f   :  { %4017 = vmatpush3.bf16.msra.mxu1 %v4359_v58 }
 0x560   :  { %4018 = vmatprep.subr.bf16.mxu1 %v4517_v37 }
 0x563   :  { %4019 = vmatpush3.bf16.msra.mxu1 %v4360_v59 }
 0x564   :  { %4020 = vmatprep.subr.bf16.mxu1 %v4517_v37 }
 0x567   :  { %4021 = vmatpush3.bf16.msra.mxu1 %v4361_v60 }
 0x568   :  { %4022 = vmatprep.subr.bf16.mxu1 %v4517_v37 }
 0x56b   :  { %4023 = vmatpush3.bf16.msra.mxu1 %v4362_v61 }
 0x56c   :  { %4024 = vmatprep.subr.bf16.mxu1 %v4517_v37 }
 0x56f   :  { %4025 = vmatpush3.bf16.msra.mxu1 %v4363_v62 }
 0x570   :  { %4065 = vmatprep.subr.bf16.mxu1 %v4517_v37 }
 0x612   :  { %v2757_v50 = vpop.f32.mrf.mxu1 }
 0x613   :  { %v2763_v51 = vmul.f32 %v2757_v50, %v4753_v39  ;;  %v3164_v50 = vld [vmem:[#allocation6 + $0x10] sm:$0xff] }
 0x614   :  { %v3973_v52 = vpop.f32.mrf.mxu1 }
 0x615   :  { %4008 = vmatmul.mubr.f32.vlgmr.msra.gmra.mxu0 %v2763_v51 }
 0x616   :  { %v2760_v53 = vpop.f32.mrf.mxu1  ;;  %4031 = vmatpush3.msra.mxu0 %v4673_v7  ;;  %4062 = vmatprep.mubr.msk.f32.mxu0 %vm4518_vm1, %v4517_v37 }
 0x617   :  { %4032 = vmatprep.subr.mxu0 %v4517_v37 }
 0x618   :  { %v3974_v54 = vpop.f32.mrf.mxu1  ;;  %4033 = vmatpush3.msra.mxu0 %v4675_v8 }
 0x619   :  { %4034 = vmatprep.subr.mxu0 %v4517_v37 }
 0x61a   :  { %4035 = vmatpush3.msra.mxu0 %v4679_v9 }
 0x61b   :  { %4036 = vmatprep.subr.mxu0 %v4517_v37 }
 0x61c   :  { %4037 = vmatpush3.msra.mxu0 %v4683_v10 }
 0x61d   :  { %4038 = vmatprep.subr.mxu0 %v4517_v37 }
 0x61e   :  { %4039 = vmatpush3.msra.mxu0 %v4687_v11 }
 0x61f   :  { %4040 = vmatprep.subr.mxu0 %v4517_v37 }
 0x620   :  { %4041 = vmatpush3.msra.mxu0 %v4691_v12 }
 0x621   :  { %4042 = vmatprep.subr.mxu0 %v4517_v37 }
 0x622   :  { %4043 = vmatpush3.msra.mxu0 %v4695_v13 }
 0x623   :  { %4044 = vmatprep.subr.mxu0 %v4517_v37 }
 0x624   :  { %4045 = vmatpush3.msra.mxu0 %v4699_v14 }
 0x625   :  { %4046 = vmatprep.subr.mxu0 %v4517_v37 }
 0x626   :  { %4047 = vmatpush3.msra.mxu0 %v4703_v15 }
 0x627   :  { %4048 = vmatprep.subr.mxu0 %v4517_v37 }
 0x628   :  { %4049 = vmatpush3.msra.mxu0 %v4707_v16 }
 0x629   :  { %4050 = vmatprep.subr.mxu0 %v4517_v37 }
 0x62a   :  { %4051 = vmatpush3.msra.mxu0 %v4711_v17 }
 0x62b   :  { %4052 = vmatprep.subr.mxu0 %v4517_v37 }
 0x62c   :  { %4053 = vmatpush3.msra.mxu0 %v4715_v18 }
 0x62d   :  { %4054 = vmatprep.subr.mxu0 %v4517_v37 }
 0x62e   :  { %4055 = vmatpush3.msra.mxu0 %v4719_v19 }
 0x62f   :  { %4056 = vmatprep.subr.mxu0 %v4517_v37 }
 0x630   :  { %4057 = vmatpush3.msra.mxu0 %v4734_v24 }
 0x631   :  { %4058 = vmatprep.subr.mxu0 %v4517_v37 }
 0x632   :  { %4059 = vmatpush3.msra.mxu0 %v4738_v25 }
 0x633   :  { %4060 = vmatprep.subr.mxu0 %v4517_v37 }
 0x634   :  { %4061 = vmatpush3.msra.mxu0 %v4742_v26 }
 0x635   :  { %4085 = vmatprep.subr.mxu0 %v4517_v37 }
 0x6d5   :  { %v2830_v63 = vpop.f32.mrf.mxu0 }
 0x6d6   :  { %v2834_v0 = vrot.slane %v2830_v63, 4 }
 0x6d7   :  { %v4009_v1 = vpop.f32.mrf.mxu0 }
 0x6d8   :  { %v2835_v2 = vadd.f32 %v2834_v0, %v2830_v63 }
 0x6da   :  { %v2836_v3 = vrot.slane %v2835_v2, 2 }
 0x6dc   :  { %v2837_v4 = vadd.f32 %v2836_v3, %v2835_v2 }
 0x6de   :  { %v2838_v5 = vrot.slane %v2837_v4, 1 }
 0x6e0   :  { %v2839_v6 = vadd.f32 %v2838_v5, %v2837_v4 }
 0x6e2   :  { %v2841_v7 = vmul.f32 0.125, %v2839_v6 }
 0x6e4   :  { %v2842_v8 = vsub.f32 %v2830_v63, %v2841_v7 }
 0x6e6   :  { %v2843_v9 = vmul.f32 %v2842_v8, %v2842_v8 }
 0x6e8   :  { %v2844_v10 = vrot.slane %v2843_v9, 4 }
 0x6ea   :  { %v2845_v11 = vadd.f32 %v2844_v10, %v2843_v9  ;;  %v3163_v10 = vld [vmem:[#allocation6 + $0x8] sm:$0xff] }
 0x6ec   :  { %v2846_v12 = vrot.slane %v2845_v11, 2 }
 0x6ee   :  { %v2847_v13 = vadd.f32 %v2846_v12, %v2845_v11  ;;  %v3162_v11 = vld [vmem:[#allocation6] sm:$0xff] }
 0x6f0   :  { %v2848_v14 = vrot.slane %v2847_v13, 1 }
 0x6f2   :  { %v2849_v15 = vadd.f32 %v2848_v14, %v2847_v13 }
 0x6f4   :  { %v2850_v16 = vmul.f32 0.125, %v2849_v15 }
 0x6f6   :  { %v2851_v17 = vadd.f32 1e-05, %v2850_v16 }
 0x6f8   :  { %4376 = vrsqrt.f32 %v2851_v17 }
 0x705   :  { %v4377_v18 = vpop.eup %4376 }
 0x706   :  { %v2853_v19 = vmul.f32 %v4377_v18, %v2842_v8 }
 0x708   :  { %v2854_v20 = vmax.f32 %v2853_v19, 0.0 }
 0x70a   :  { %v2855_v21 = vpack.c.bf16 %v2854_v20, %v2854_v20 }
 0x70c   :  { %4027 = vmatmul.mubr.bf16.vlgmr.msra.gmra.mxu1 %v2855_v21 }
 0x70d   :  { %4081 = vmatprep.mubr.msk.bf16.mxu1 %vm4518_vm1, %v4517_v37  ;;  %4066 = vmatpush3.bf16.msra.mxu1 %v4364_v27 }
 0x70e   :  { %4067 = vmatprep.subr.bf16.mxu1 %v4517_v37 }
 0x711   :  { %4068 = vmatpush3.bf16.msra.mxu1 %v4365_v28 }
 0x712   :  { %4069 = vmatprep.subr.bf16.mxu1 %v4517_v37 }
 0x715   :  { %4070 = vmatpush3.bf16.msra.mxu1 %v4366_v29 }
 0x716   :  { %4071 = vmatprep.subr.bf16.mxu1 %v4517_v37 }
 0x719   :  { %4072 = vmatpush3.bf16.msra.mxu1 %v4367_v30 }
 0x71a   :  { %4073 = vmatprep.subr.bf16.mxu1 %v4517_v37 }
 0x71d   :  { %4074 = vmatpush3.bf16.msra.mxu1 %v4368_v31 }
 0x71e   :  { %4075 = vmatprep.subr.bf16.mxu1 %v4517_v37 }
 0x721   :  { %4076 = vmatpush3.bf16.msra.mxu1 %v4369_v32 }
 0x722   :  { %4077 = vmatprep.subr.bf16.mxu1 %v4517_v37 }
 0x725   :  { %4078 = vmatpush3.bf16.msra.mxu1 %v4370_v33 }
 0x726   :  { %4079 = vmatprep.subr.bf16.mxu1 %v4517_v37 }
 0x729   :  { %4080 = vmatpush3.bf16.msra.mxu1 %v4371_v34 }
 0x7cc   :  { %v2955_v22 = vpop.f32.mrf.mxu1 }
 0x7cd   :  { %v2961_v23 = vmul.f32 %v2955_v22, %v4753_v39  ;;  %v3174_v39 = vld [vmem:[#allocation6 + $0x60] sm:$0xff] }
 0x7ce   :  { %v4028_v24 = vpop.f32.mrf.mxu1 }
 0x7cf   :  { %4063 = vmatmul.mubr.f32.vlgmr.msra.gmra.mxu0 %v2961_v23 }
 0x7d0   :  { %v2958_v25 = vpop.f32.mrf.mxu1  ;;  %4117 = vmatprep.mubr.msk.f32.mxu0 %vm4518_vm1, %v4517_v37  ;;  %4086 = vmatpush3.msra.mxu0 %v3177_v35 }
 0x7d1   :  { %4087 = vmatprep.subr.mxu0 %v4517_v37 }
 0x7d2   :  { %v4029_v26 = vpop.f32.mrf.mxu1  ;;  %4088 = vmatpush3.msra.mxu0 %v3176_v36 }
 0x7d3   :  { %4089 = vmatprep.subr.mxu0 %v4517_v37 }
 0x7d4   :  { %4090 = vmatpush3.msra.mxu0 %v3175_v38 }
 0x7d5   :  { %4091 = vmatprep.subr.mxu0 %v4517_v37 }
 0x7d6   :  { %4092 = vmatpush3.msra.mxu0 %v3174_v39 }
 0x7d7   :  { %4093 = vmatprep.subr.mxu0 %v4517_v37 }
 0x7d8   :  { %4094 = vmatpush3.msra.mxu0 %v3173_v40 }
 0x7d9   :  { %4095 = vmatprep.subr.mxu0 %v4517_v37 }
 0x7da   :  { %4096 = vmatpush3.msra.mxu0 %v3172_v41 }
 0x7db   :  { %4097 = vmatprep.subr.mxu0 %v4517_v37 }
 0x7dc   :  { %4098 = vmatpush3.msra.mxu0 %v3171_v42 }
 0x7dd   :  { %4099 = vmatprep.subr.mxu0 %v4517_v37 }
 0x7de   :  { %4100 = vmatpush3.msra.mxu0 %v3170_v44 }
 0x7df   :  { %4101 = vmatprep.subr.mxu0 %v4517_v37 }
 0x7e0   :  { %4102 = vmatpush3.msra.mxu0 %v3169_v45 }
 0x7e1   :  { %4103 = vmatprep.subr.mxu0 %v4517_v37 }
 0x7e2   :  { %4104 = vmatpush3.msra.mxu0 %v3168_v46 }
 0x7e3   :  { %4105 = vmatprep.subr.mxu0 %v4517_v37 }
 0x7e4   :  { %4106 = vmatpush3.msra.mxu0 %v3167_v47 }
 0x7e5   :  { %4107 = vmatprep.subr.mxu0 %v4517_v37 }
 0x7e6   :  { %4108 = vmatpush3.msra.mxu0 %v3166_v48 }
 0x7e7   :  { %4109 = vmatprep.subr.mxu0 %v4517_v37 }
 0x7e8   :  { %4110 = vmatpush3.msra.mxu0 %v3165_v49 }
 0x7e9   :  { %4111 = vmatprep.subr.mxu0 %v4517_v37 }
 0x7ea   :  { %4112 = vmatpush3.msra.mxu0 %v3164_v50 }
 0x7eb   :  { %4113 = vmatprep.subr.mxu0 %v4517_v37 }
 0x7ec   :  { %4114 = vmatpush3.msra.mxu0 %v3163_v10 }
 0x7ed   :  { %4115 = vmatprep.subr.mxu0 %v4517_v37 }
 0x7ee   :  { %4116 = vmatpush3.msra.mxu0 %v3162_v11 }
 0x88f   :  { %v3028_v51 = vpop.f32.mrf.mxu0 }
 0x890   :  { %v3032_v52 = vrot.slane %v3028_v51, 4 }
 0x891   :  { %v4064_v53 = vpop.f32.mrf.mxu0 }
 0x892   :  { %v3033_v54 = vadd.f32 %v3032_v52, %v3028_v51 }
 0x894   :  { %v3034_v55 = vrot.slane %v3033_v54, 2 }
 0x896   :  { %v3035_v56 = vadd.f32 %v3034_v55, %v3033_v54 }
 0x898   :  { %v3036_v57 = vrot.slane %v3035_v56, 1 }
 0x89a   :  { %v3037_v58 = vadd.f32 %v3036_v57, %v3035_v56 }
 0x89c   :  { %v3038_v59 = vmul.f32 0.125, %v3037_v58 }
 0x89e   :  { %v3039_v60 = vsub.f32 %v3028_v51, %v3038_v59 }
 0x8a0   :  { %v3040_v61 = vmul.f32 %v3039_v60, %v3039_v60 }
 0x8a2   :  { %v3041_v62 = vrot.slane %v3040_v61, 4 }
 0x8a4   :  { %v3042_v63 = vadd.f32 %v3041_v62, %v3040_v61 }
 0x8a6   :  { %v3043_v0 = vrot.slane %v3042_v63, 2 }
 0x8a8   :  { %v3044_v1 = vadd.f32 %v3043_v0, %v3042_v63 }
 0x8aa   :  { %v3045_v2 = vrot.slane %v3044_v1, 1 }
 0x8ac   :  { %v3046_v3 = vadd.f32 %v3045_v2, %v3044_v1 }
 0x8ae   :  { %v3047_v4 = vmul.f32 0.125, %v3046_v3 }
 0x8b0   :  { %v3048_v5 = vadd.f32 1e-05, %v3047_v4 }
 0x8b2   :  { %4378 = vrsqrt.f32 %v3048_v5 }
 0x8bf   :  { %v4379_v6 = vpop.eup %4378 }
 0x8c0   :  { %v3050_v7 = vmul.f32 %v4379_v6, %v3039_v60 }
 0x8c2   :  { %v3051_v8 = vmax.f32 %v3050_v7, 0.0 }
 0x8c4   :  { %v3052_v9 = vpack.c.bf16 %v3051_v8, %v3051_v8 }
 0x8c6   :  { %4082 = vmatmul.mubr.bf16.vlgmr.msra.gmra.mxu1 %v3052_v9 }
 0x986   :  { %v3151_v12 = vpop.f32.mrf.mxu1 }
 0x987   :  { %v3161_v13 = vmul.f32 %v4757_v43, %v3151_v12 }
 0x988   :  { %v4083_v14 = vpop.f32.mrf.mxu1 }
 0x989   :  { %4118 = vmatmul.mubr.f32.vlgmr.msra.gmra.mxu0 %v3161_v13 }
 0x98a   :  { %v3154_v15 = vpop.f32.mrf.mxu1 }
 0x98c   :  { %v4084_v16 = vpop.f32.mrf.mxu1 }
 0xa49   :  { %v3244_v17 = vpop.f32.mrf.mxu0 }
 0xa4a   :  { %3248 = vst [vmem:[#allocation12] sm:$0xff] %v3244_v17 }
 0xa4b   :  { %v4119_v18 = vpop.f32.mrf.mxu0 }
 0xa4c   :  { %4491 = shalt.err (!%p4488_p1)
}
 0xa4d   :  { %3258 = dma.vmem_to_hbm [thread:$0]  %s3256_s27, 128, %s4907_s13, [#allocation5]  }
 0xa4e   :  { %4506 = dma.done.wait [#allocation5], 128  }
 0xa4f   :  { %4507 = vsyncadd [#allocation5], 4294967168 }
 0xa50   :  { %3262 = vsyncpa [#allocation4], 1 }
 0xa51   :  { %3263 = vsyncpa [#allocation7], 1 }
 0xa52   :  { %3264 = vsyncpa [#allocation10], 1 }
 0xa53   :  { %3265 = vsyncpa [#allocation5], 1 }

</bundles_post_ra>
